<compile_context>
chip_gen: v6e
topology: v6e:2x2x1
jax: 0.10.0
libtpu: 0.0.40
codegen_flags: <defaults>
</compile_context>

<pallas_src>
import functools

import jax
import jax.numpy as jnp
from jax.experimental import pallas as pl
from jax.experimental.pallas import tpu as pltpu

IN_FEATURES = 28 * 28          # 784
HIDDEN = 512
OUT_FEATURES = 10
OUT_PAD = 128                  # lane-dense output slab
DEFAULT_BATCH_TILE = 512       # large tiles amortize per-grid-step overhead


def _round_up(x, m):
    return ((x + m - 1) // m) * m


def _choose_batch_tile(batch, batch_tile):
    """Pick a batch tile: multiple of 16, large, and >= 2 tiles when batch >= 256
    (so v7x's two TensorCores both get work via the 'parallel' grid axis)."""
    b16 = max(16, _round_up(batch, 16))
    if b16 < 256:
        return min(b16, batch_tile)
    return min(batch_tile, max(128, _round_up((b16 + 1) // 2, 16)))


def mlp_kernel(x_ref, w1_ref, b1_ref, w2_ref, b2_ref, w3_ref, b3_ref, o_ref):
    # x_ref: (TB, 784) f32 (cast to bf16 here, in VMEM); weights bf16; biases
    # f32; output f32.  Three MXU matmuls with f32 accumulation + VPU bias/ReLU.
    x = x_ref[...].astype(jnp.bfloat16)
    h1 = jnp.dot(x, w1_ref[...], preferred_element_type=jnp.float32) + b1_ref[...]
    h1 = jnp.maximum(h1, 0.0).astype(jnp.bfloat16)
    h2 = jnp.dot(h1, w2_ref[...], preferred_element_type=jnp.float32) + b2_ref[...]
    h2 = jnp.maximum(h2, 0.0).astype(jnp.bfloat16)
    o_ref[...] = jnp.dot(h2, w3_ref[...], preferred_element_type=jnp.float32) + b3_ref[...]


def prepare_params(params):
    """Cast PyTorch-shaped (in, out) params into the kernel's bf16/f32 layout."""
    w1, b1, w2, b2, w3, b3 = params
    # Only the final output dim is zero-padded (10 -> 128) for lane-dense stores.
    w3p = jnp.pad(w3, ((0, 0), (0, OUT_PAD - OUT_FEATURES))).astype(jnp.bfloat16)
    b3p = jnp.pad(b3, ((0, 0), (0, OUT_PAD - OUT_FEATURES))).astype(jnp.float32)
    return (
        w1.astype(jnp.bfloat16),
        b1.astype(jnp.float32),
        w2.astype(jnp.bfloat16),
        b2.astype(jnp.float32),
        w3p,
        b3p,
    )


@functools.partial(jax.jit, static_argnames=("batch_tile",))
def net_forward(x_nchw, kernel_params, batch_tile=DEFAULT_BATCH_TILE):
    """x_nchw: (B, 1, 28, 28) float32 -> logits (B, 10) float32."""
    w1, b1, w2, b2, w3, b3 = kernel_params
    B = x_nchw.shape[0]

    # nn.Flatten(start_dim=1): a free reshape/view; stays f32 (cast is in-kernel).
    x_flat = x_nchw.reshape(B, IN_FEATURES)

    tb = _choose_batch_tile(B, batch_tile)
    b_pad = _round_up(B, tb)
    if b_pad != B:
        # Padded rows produce garbage logits; they are sliced off below.
        x_flat = jnp.pad(x_flat, ((0, b_pad - B), (0, 0)))
    num_tiles = b_pad // tb

    const = lambda i: (0, 0)  # weights/biases resident across all batch tiles
    flops = 2 * b_pad * (IN_FEATURES * HIDDEN + HIDDEN * HIDDEN + HIDDEN * OUT_PAD)
    bytes_accessed = (
        x_flat.size * 4
        + (w1.size + w2.size + w3.size) * 2
        + (b1.size + b2.size + b3.size) * 4
        + b_pad * OUT_PAD * 4
    )

    out = pl.pallas_call(
        mlp_kernel,
        out_shape=jax.ShapeDtypeStruct((b_pad, OUT_PAD), jnp.float32),
        grid=(num_tiles,),
        in_specs=[
            pl.BlockSpec((tb, IN_FEATURES), lambda i: (i, 0)),   # x: full last dim
            pl.BlockSpec((IN_FEATURES, HIDDEN), const),
            pl.BlockSpec((1, HIDDEN), const),
            pl.BlockSpec((HIDDEN, HIDDEN), const),
            pl.BlockSpec((1, HIDDEN), const),
            pl.BlockSpec((HIDDEN, OUT_PAD), const),
            pl.BlockSpec((1, OUT_PAD), const),
        ],
        out_specs=pl.BlockSpec((tb, OUT_PAD), lambda i: (i, 0)),
        compiler_params=pltpu.CompilerParams(
            dimension_semantics=("parallel",),
        ),
        cost_estimate=pl.CostEstimate(
            flops=flops, transcendentals=0, bytes_accessed=bytes_accessed
        ),
    )(x_flat, w1, b1, w2, b2, w3, b3)

    return out[:B, :OUT_FEATURES]


def init_params(key):
    """Deterministic init matching the nn.Linear shapes of the module (f32)."""
    k1, k2, k3, k4, k5, k6 = jax.random.split(key, 6)

    def linear(kw, kb, fan_in, fan_out):
        bound = 1.0 / jnp.sqrt(fan_in)
        w = jax.random.uniform(kw, (fan_in, fan_out), jnp.float32, -bound, bound)
        b = jax.random.uniform(kb, (1, fan_out), jnp.float32, -bound, bound)
        return w, b

    w1, b1 = linear(k1, k2, IN_FEATURES, HIDDEN)
    w2, b2 = linear(k3, k4, HIDDEN, HIDDEN)
    w3, b3 = linear(k5, k6, HIDDEN, OUT_FEATURES)
    return (w1, b1, w2, b2, w3, b3)


def ref_forward_bf16(x_nchw, params):
    """Pure-JAX reference with the same bf16-weight / f32-accumulate recipe."""
    w1, b1, w2, b2, w3, b3 = params
    xf = x_nchw.reshape(x_nchw.shape[0], -1).astype(jnp.bfloat16)
    h = jnp.dot(xf, w1.astype(jnp.bfloat16), preferred_element_type=jnp.float32) + b1
    h = jnp.maximum(h, 0.0).astype(jnp.bfloat16)
    h = jnp.dot(h, w2.astype(jnp.bfloat16), preferred_element_type=jnp.float32) + b2
    h = jnp.maximum(h, 0.0).astype(jnp.bfloat16)
    return jnp.dot(h, w3.astype(jnp.bfloat16), preferred_element_type=jnp.float32) + b3


if __name__ == "__main__":
    key = jax.random.PRNGKey(0)
    k_x, k_p = jax.random.split(key)

    # Small MNIST-like batch: (B=16, C=1, H=28, W=28) NCHW.
    x = jax.random.normal(k_x, (16, 1, 28, 28), jnp.float32)
    params = init_params(k_p)
    kernel_params = prepare_params(params)

    logits = net_forward(x, kernel_params)
    jax.block_until_ready(logits)
    assert logits.shape == (16, OUT_FEATURES)

    # Apples-to-apples bf16 reference (same precision recipe as the kernel).
    ref_bf16 = ref_forward_bf16(x, params)
    assert jnp.allclose(logits, ref_bf16, atol=5e-3, rtol=5e-3)

    # Full-f32 reference: looser tolerance (bf16 weights/activations are intentional).
    w1, b1, w2, b2, w3, b3 = params
    xf = x.reshape(x.shape[0], -1)
    ref = jnp.maximum(xf @ w1 + b1, 0.0)
    ref = jnp.maximum(ref @ w2 + b2, 0.0)
    ref = ref @ w3 + b3
    assert jnp.allclose(logits, ref, atol=5e-2, rtol=5e-2)

    print("KERNEL_OK")
</pallas_src>

<mosaic_0001>
module attributes {stable_mosaic.version = 11 : i64} {
  func.func @mlp_kernel(%arg0: i32, %arg1: memref<16x784xf32, #tpu.memory_space<vmem>>, %arg2: memref<784x512xbf16, #tpu.memory_space<vmem>>, %arg3: memref<1x512xf32, #tpu.memory_space<vmem>>, %arg4: memref<512x512xbf16, #tpu.memory_space<vmem>>, %arg5: memref<1x512xf32, #tpu.memory_space<vmem>>, %arg6: memref<512x128xbf16, #tpu.memory_space<vmem>>, %arg7: memref<1x128xf32, #tpu.memory_space<vmem>>, %arg8: memref<16x128xf32, #tpu.memory_space<vmem>>) attributes {dimension_semantics = [#tpu.dimension_semantics<parallel>], iteration_bounds = array<i64: 1>, scalar_prefetch = 0 : i64, scratch_operands = 0 : i64, tpu.core_type = #tpu.core_type<tc>, window_params = [{transform_indices = @transform_0, window_bounds = array<i64: 16, 784>}, {pipeline_mode = #tpu.pipeline_mode<synchronous>, transform_indices = @transform_1, window_bounds = array<i64: 784, 512>}, {pipeline_mode = #tpu.pipeline_mode<synchronous>, transform_indices = @transform_2, window_bounds = array<i64: 1, 512>}, {pipeline_mode = #tpu.pipeline_mode<synchronous>, transform_indices = @transform_3, window_bounds = array<i64: 512, 512>}, {pipeline_mode = #tpu.pipeline_mode<synchronous>, transform_indices = @transform_4, window_bounds = array<i64: 1, 512>}, {pipeline_mode = #tpu.pipeline_mode<synchronous>, transform_indices = @transform_5, window_bounds = array<i64: 512, 128>}, {pipeline_mode = #tpu.pipeline_mode<synchronous>, transform_indices = @transform_6, window_bounds = array<i64: 1, 128>}, {transform_indices = @transform_7, window_bounds = array<i64: 16, 128>}]} {
    %c0 = arith.constant 0 : index
    %c0_0 = arith.constant 0 : index
    %0 = vector.load %arg1[%c0, %c0_0] : memref<16x784xf32, #tpu.memory_space<vmem>>, vector<16x784xf32>
    %1 = arith.truncf %0 : vector<16x784xf32> to vector<16x784xbf16>
    %c0_1 = arith.constant 0 : index
    %c0_2 = arith.constant 0 : index
    %2 = vector.load %arg2[%c0_1, %c0_2] : memref<784x512xbf16, #tpu.memory_space<vmem>>, vector<784x512xbf16>
    %cst = arith.constant dense<0.000000e+00> : vector<16x512xf32>
    %3 = tpu.matmul %1, %2, %cst {dimension_numbers = #tpu.dot_dimension_numbers<[1], [0], [0], [1], [0, 0, 1, 1], [], []>} : vector<16x784xbf16>, vector<784x512xbf16>, vector<16x512xf32> -> vector<16x512xf32>
    %c0_3 = arith.constant 0 : index
    %c0_4 = arith.constant 0 : index
    %4 = vector.load %arg3[%c0_3, %c0_4] : memref<1x512xf32, #tpu.memory_space<vmem>>, vector<1x512xf32>
    %5 = vector.broadcast %4 : vector<1x512xf32> to vector<16x512xf32>
    %6 = arith.addf %3, %5 : vector<16x512xf32>
    %cst_5 = arith.constant 0.000000e+00 : f32
    %7 = vector.broadcast %cst_5 : f32 to vector<16x512xf32>
    %8 = arith.maximumf %6, %7 : vector<16x512xf32>
    %9 = arith.truncf %8 : vector<16x512xf32> to vector<16x512xbf16>
    %c0_6 = arith.constant 0 : index
    %c0_7 = arith.constant 0 : index
    %10 = vector.load %arg4[%c0_6, %c0_7] : memref<512x512xbf16, #tpu.memory_space<vmem>>, vector<512x512xbf16>
    %cst_8 = arith.constant dense<0.000000e+00> : vector<16x512xf32>
    %11 = tpu.matmul %9, %10, %cst_8 {dimension_numbers = #tpu.dot_dimension_numbers<[1], [0], [0], [1], [0, 0, 1, 1], [], []>} : vector<16x512xbf16>, vector<512x512xbf16>, vector<16x512xf32> -> vector<16x512xf32>
    %c0_9 = arith.constant 0 : index
    %c0_10 = arith.constant 0 : index
    %12 = vector.load %arg5[%c0_9, %c0_10] : memref<1x512xf32, #tpu.memory_space<vmem>>, vector<1x512xf32>
    %13 = vector.broadcast %12 : vector<1x512xf32> to vector<16x512xf32>
    %14 = arith.addf %11, %13 : vector<16x512xf32>
    %cst_11 = arith.constant 0.000000e+00 : f32
    %15 = vector.broadcast %cst_11 : f32 to vector<16x512xf32>
    %16 = arith.maximumf %14, %15 : vector<16x512xf32>
    %17 = arith.truncf %16 : vector<16x512xf32> to vector<16x512xbf16>
    %c0_12 = arith.constant 0 : index
    %c0_13 = arith.constant 0 : index
    %18 = vector.load %arg6[%c0_12, %c0_13] : memref<512x128xbf16, #tpu.memory_space<vmem>>, vector<512x128xbf16>
    %cst_14 = arith.constant dense<0.000000e+00> : vector<16x128xf32>
    %19 = tpu.matmul %17, %18, %cst_14 {dimension_numbers = #tpu.dot_dimension_numbers<[1], [0], [0], [1], [0, 0, 1, 1], [], []>} : vector<16x512xbf16>, vector<512x128xbf16>, vector<16x128xf32> -> vector<16x128xf32>
    %c0_15 = arith.constant 0 : index
    %c0_16 = arith.constant 0 : index
    %20 = vector.load %arg7[%c0_15, %c0_16] : memref<1x128xf32, #tpu.memory_space<vmem>>, vector<1x128xf32>
    %21 = vector.broadcast %20 : vector<1x128xf32> to vector<16x128xf32>
    %22 = arith.addf %19, %21 : vector<16x128xf32>
    %c0_17 = arith.constant 0 : index
    %c0_18 = arith.constant 0 : index
    %23 = vector.load %arg8[%c0_17, %c0_18] : memref<16x128xf32, #tpu.memory_space<vmem>>, vector<16x128xf32>
    tpu.vector_store %arg8[%c0_17, %c0_18], %22 {strides = array<i32>} : memref<16x128xf32, #tpu.memory_space<vmem>>, vector<16x128xf32>,
    return
  }
  func.func @transform_0(%arg0: i32) -> (i32, i32) {
    %c0_i32 = arith.constant 0 : i32
    %c0_i32_0 = arith.constant 0 : i32
    return %arg0, %c0_i32 : i32, i32
  }
  func.func @transform_1(%arg0: i32) -> (i32, i32) {
    %c0_i32 = arith.constant 0 : i32
    %c0_i32_0 = arith.constant 0 : i32
    %c0_i32_1 = arith.constant 0 : i32
    return %c0_i32, %c0_i32_0 : i32, i32
  }
  func.func @transform_2(%arg0: i32) -> (i32, i32) {
    %c0_i32 = arith.constant 0 : i32
    %c0_i32_0 = arith.constant 0 : i32
    %c0_i32_1 = arith.constant 0 : i32
    return %c0_i32, %c0_i32_0 : i32, i32
  }
  func.func @transform_3(%arg0: i32) -> (i32, i32) {
    %c0_i32 = arith.constant 0 : i32
    %c0_i32_0 = arith.constant 0 : i32
    %c0_i32_1 = arith.constant 0 : i32
    return %c0_i32, %c0_i32_0 : i32, i32
  }
  func.func @transform_4(%arg0: i32) -> (i32, i32) {
    %c0_i32 = arith.constant 0 : i32
    %c0_i32_0 = arith.constant 0 : i32
    %c0_i32_1 = arith.constant 0 : i32
    return %c0_i32, %c0_i32_0 : i32, i32
  }
  func.func @transform_5(%arg0: i32) -> (i32, i32) {
    %c0_i32 = arith.constant 0 : i32
    %c0_i32_0 = arith.constant 0 : i32
    %c0_i32_1 = arith.constant 0 : i32
    return %c0_i32, %c0_i32_0 : i32, i32
  }
  func.func @transform_6(%arg0: i32) -> (i32, i32) {
    %c0_i32 = arith.constant 0 : i32
    %c0_i32_0 = arith.constant 0 : i32
    %c0_i32_1 = arith.constant 0 : i32
    return %c0_i32, %c0_i32_0 : i32, i32
  }
  func.func @transform_7(%arg0: i32) -> (i32, i32) {
    %c0_i32 = arith.constant 0 : i32
    %c0_i32_0 = arith.constant 0 : i32
    return %arg0, %c0_i32 : i32, i32
  }
}

</mosaic_0001>

<bundles_post_ra>
// kernel: net_forward.1
= control target key start
LH: loop header
LB: loop body
LE: loop exit
PB: predicated region body
PF: predicated region fallthrough
CT: control target
= control target key end

     0   :  { %12 = vsyncpa [#allocation3], 0  ;;  %s4737_s0 = inlined_call_operand.vmem [shape: f32[16,784], index: 0, kind: input, shape index: {}]   ;;  %s4738_s1 = inlined_call_operand.vmem [shape: bf16[784,512], index: 1, kind: input, shape index: {}]   ;;  %s4739_s2 = inlined_call_operand.vmem [shape: f32[1,512], index: 2, kind: input, shape index: {}]   ;;  %s4740_s3 = inlined_call_operand.hbm [shape: bf16[512,512], index: 3, kind: input, shape index: {}]   ;;  %s4741_s4 = inlined_call_operand.vmem [shape: f32[1,512], index: 4, kind: input, shape index: {}]   ;;  %s4742_s5 = inlined_call_operand.hbm [shape: bf16[512,128], index: 5, kind: input, shape index: {}]   ;;  %s4743_s6 = inlined_call_operand.vmem [shape: f32[1,128], index: 6, kind: input, shape index: {}]   ;;  %s4744_s7 = inlined_call_operand.hbm [shape: f32[16,128], index: 7, kind: output, shape index: {}]  }
   0x1   :  { %13 = vsyncpa [#allocation6], 0 }
   0x2   :  { %14 = vsyncpa [#allocation4], 0  ;;  %s3971_s24 = smov [#allocation2]  }
   0x3   :  { %s26_s25 = sshll.u32 %s3971_s24, 4  ;;  %s27_s25 = int_to_ptr.vmem [resolvable:$true] %s26_s25 }
   0x4   :  { %s3913_s26 = scalar_lea.vmem %s27_s25, 16384  ;;  %p3918_p1 = scmp.lt.s32.totalorder %s27_s25, %s27_s25 }
   0x5   :  { %p3914_p0 = scmp.ne.s32.totalorder %s27_s25, %s3913_s26  ;;  %p3919_p2 = scmp.lt.s32.totalorder %s3913_s26, %s3913_s26 }
   0x7   :  { %p3920_p3 = por %p3919_p2, %p3918_p1 }
   0x9   :  { %p3921_p4 = pnand %p3920_p3, %p3914_p0 }
   0xb   :  { %3924 = shalt.err (!%p3921_p4)
}
   0xc   :  { %s3972_s27 = smov 256   ;;  %s3973_s28 = smov 16  }
   0xd   :  { %32 = dma.hbm_to_vmem [thread:$0]  %s4740_s3, 16384, %s27_s25, [#allocation3], %s3972_s27, %s3972_s27, %s3973_s28  }
   0xe   :  { %s3974_s8 = smov [#allocation5]  }
   0xf   :  { %s40_s9 = sshll.u32 %s3974_s8, 4  ;;  %s41_s9 = int_to_ptr.vmem [resolvable:$true] %s40_s9 }
  0x10   :  { %s3933_s10 = scalar_lea.vmem %s41_s9, 4096  ;;  %p3938_p6 = scmp.lt.s32.totalorder %s41_s9, %s41_s9 }
  0x11   :  { %p3934_p5 = scmp.ne.s32.totalorder %s41_s9, %s3933_s10  ;;  %p3939_p7 = scmp.lt.s32.totalorder %s3933_s10, %s3933_s10 }
  0x13   :  { %p3940_p8 = por %p3939_p7, %p3938_p6 }
  0x15   :  { %p3941_p9 = pnand %p3940_p8, %p3934_p5 }
  0x17   :  { %3944 = shalt.err (!%p3941_p9)
}
  0x18   :  { %s3975_s11 = smov 64   ;;  %s3976_s12 = smov 4  }
  0x19   :  { %46 = dma.hbm_to_vmem [thread:$0]  %s4742_s5, 4096, %s41_s9, [#allocation6], %s3975_s11, %s3975_s11, %s3976_s12  }
  0x1a   :  { %3965 = dma.done.wait [#allocation3], 16384  }
  0x1b   :  { %3966 = vsyncadd [#allocation3], 4294950912 }
  0x1c   :  { %3967 = dma.done.wait [#allocation6], 4096  }
  0x1d   :  { %3968 = vsyncadd [#allocation6], 4294963200  ;;  %v3387_v0 = vld [vmem:[%s4738_s1 + $0xe4] ss:$16 sps:$4 sm:$0xff]   ;;  %v3391_v2 = vld [vmem:[%s4738_s1 + $0xe0] ss:$16 sps:$4 sm:$0xff]  }
  0x1e   :  { %v3389_v1 = vld [vmem:[%s4738_s1 + $0x2e4] ss:$16 sps:$4 sm:$0xff]   ;;  %1279 = vmatprep.subr.bf16.mxu0 %v3387_v0  ;;  %v3392_v3 = vld [vmem:[%s4738_s1 + $0x2e0] ss:$16 sps:$4 sm:$0xff]   ;;  %v57_v46 = vld [vmem:[%s4737_s0 + $0x8] sm:$0xff]  ;;  %vm1275_vm0 = vcmask 130048  }
  0x1f   :  { %1322 = vmatprep.subr.bf16.mxu1 %v3389_v1  ;;  %v3393_v4 = vld [vmem:[%s4738_s1 + $0xc4] ss:$16 sps:$4 sm:$0xff]   ;;  %1280 = vmatpush1.bf16.msra.mxu0 %v3391_v2  ;;  %v3397_v6 = vld [vmem:[%s4738_s1 + $0xc0] ss:$16 sps:$4 sm:$0xff]   ;;  %v59_v48 = vld [vmem:[%s4737_s0 + $0x18] sm:$0xff]  ;;  %s3978_s30 = smov [#allocation7]  }
  0x20   :  { %1323 = vmatpush1.bf16.msra.mxu1 %v3392_v3  ;;  %v3395_v5 = vld [vmem:[%s4738_s1 + $0x2c4] ss:$16 sps:$4 sm:$0xff]   ;;  %1281 = vmatprep.subr.bf16.mxu0 %v3393_v4  ;;  %v3398_v7 = vld [vmem:[%s4738_s1 + $0x2c0] ss:$16 sps:$4 sm:$0xff]   ;;  %s2961_s8 = sshll.u32 %s3978_s30, 4  ;;  %s2962_s8 = int_to_ptr.vmem [resolvable:$true] %s2961_s8 }
  0x21   :  { %1324 = vmatprep.subr.bf16.mxu1 %v3395_v5  ;;  %v3399_v8 = vld [vmem:[%s4738_s1 + $0xa4] ss:$16 sps:$4 sm:$0xff]   ;;  %v3403_v10 = vld [vmem:[%s4738_s1 + $0xa0] ss:$16 sps:$4 sm:$0xff]   ;;  %s3945_s9 = scalar_lea.vmem %s2962_s8, 256  ;;  %p3950_p11 = scmp.lt.s32.totalorder %s2962_s8, %s2962_s8 }
  0x22   :  { %v3401_v9 = vld [vmem:[%s4738_s1 + $0x2a4] ss:$16 sps:$4 sm:$0xff]   ;;  %v3404_v11 = vld [vmem:[%s4738_s1 + $0x2a0] ss:$16 sps:$4 sm:$0xff]   ;;  %p3946_p10 = scmp.ne.s32.totalorder %s2962_s8, %s3945_s9  ;;  %p3951_p12 = scmp.lt.s32.totalorder %s3945_s9, %s3945_s9 }
  0x23   :  { %1282 = vmatpush1.bf16.msra.mxu0 %v3397_v6  ;;  %v3405_v12 = vld [vmem:[%s4738_s1 + $0x84] ss:$16 sps:$4 sm:$0xff]   ;;  %v3409_v14 = vld [vmem:[%s4738_s1 + $0x80] ss:$16 sps:$4 sm:$0xff]  }
  0x24   :  { %1325 = vmatpush1.bf16.msra.mxu1 %v3398_v7  ;;  %1283 = vmatprep.subr.bf16.mxu0 %v3399_v8  ;;  %v3407_v13 = vld [vmem:[%s4738_s1 + $0x284] ss:$16 sps:$4 sm:$0xff]   ;;  %v3410_v15 = vld [vmem:[%s4738_s1 + $0x280] ss:$16 sps:$4 sm:$0xff]   ;;  %v63_v7 = vld [vmem:[%s4737_s0 + $0x38] sm:$0xff]  ;;  %p3952_p13 = por %p3951_p12, %p3950_p11 }
  0x25   :  { %1326 = vmatprep.subr.bf16.mxu1 %v3401_v9  ;;  %v3411_v16 = vld [vmem:[%s4738_s1 + $0x64] ss:$16 sps:$4 sm:$0xff]   ;;  %v3415_v18 = vld [vmem:[%s4738_s1 + $0x60] ss:$16 sps:$4 sm:$0xff]   ;;  %v65_v9 = vld [vmem:[%s4737_s0 + $0x48] sm:$0xff] }
  0x26   :  { %v3413_v17 = vld [vmem:[%s4738_s1 + $0x264] ss:$16 sps:$4 sm:$0xff]   ;;  %v3416_v19 = vld [vmem:[%s4738_s1 + $0x260] ss:$16 sps:$4 sm:$0xff]   ;;  %p3953_p0 = pnand %p3952_p13, %p3946_p10 }
  0x27   :  { %1284 = vmatpush1.bf16.msra.mxu0 %v3403_v10  ;;  %v3417_v20 = vld [vmem:[%s4738_s1 + $0x44] ss:$16 sps:$4 sm:$0xff]   ;;  %v3421_v22 = vld [vmem:[%s4738_s1 + $0x40] ss:$16 sps:$4 sm:$0xff]  }
  0x28   :  { %1327 = vmatpush1.bf16.msra.mxu1 %v3404_v11  ;;  %1285 = vmatprep.subr.bf16.mxu0 %v3405_v12  ;;  %v3419_v21 = vld [vmem:[%s4738_s1 + $0x244] ss:$16 sps:$4 sm:$0xff]   ;;  %v3422_v23 = vld [vmem:[%s4738_s1 + $0x240] ss:$16 sps:$4 sm:$0xff]  }
  0x29   :  { %1328 = vmatprep.subr.bf16.mxu1 %v3407_v13  ;;  %v3423_v24 = vld [vmem:[%s4738_s1 + $0x24] ss:$16 sps:$4 sm:$0xff]   ;;  %v3427_v26 = vld [vmem:[%s4738_s1 + $0x20] ss:$16 sps:$4 sm:$0xff]  }
  0x2a   :  { %v3425_v25 = vld [vmem:[%s4738_s1 + $0x224] ss:$16 sps:$4 sm:$0xff]   ;;  %v3428_v27 = vld [vmem:[%s4738_s1 + $0x220] ss:$16 sps:$4 sm:$0xff]  }
  0x2b   :  { %1286 = vmatpush1.bf16.msra.mxu0 %v3409_v14  ;;  %v3429_v28 = vld [vmem:[%s4738_s1 + $0x4] ss:$16 sps:$4 sm:$0xff]   ;;  %v3433_v30 = vld [vmem:[%s4738_s1] ss:$16 sps:$4 sm:$0xff]  }
  0x2c   :  { %1329 = vmatpush1.bf16.msra.mxu1 %v3410_v15  ;;  %1287 = vmatprep.subr.bf16.mxu0 %v3411_v16  ;;  %v3431_v29 = vld [vmem:[%s4738_s1 + $0x204] ss:$16 sps:$4 sm:$0xff]   ;;  %v3434_v31 = vld [vmem:[%s4738_s1 + $0x200] ss:$16 sps:$4 sm:$0xff]  }
  0x2d   :  { %1330 = vmatprep.subr.bf16.mxu1 %v3413_v17  ;;  %v3435_v32 = vld [vmem:[%s4738_s1 + $0x1e4] ss:$16 sps:$4 sm:$0xff]   ;;  %v3439_v34 = vld [vmem:[%s4738_s1 + $0x1e0] ss:$16 sps:$4 sm:$0xff]   ;;  %v3494_v17 = vld [vmem:[%s4738_s1 + $0xec] ss:$16 sps:$4 sm:$0xff]  }
  0x2e   :  { %v3437_v33 = vld [vmem:[%s4738_s1 + $0x3e4] ss:$16 sps:$4 sm:$0xff]   ;;  %v3440_v35 = vld [vmem:[%s4738_s1 + $0x3e0] ss:$16 sps:$4 sm:$0xff]  }
  0x2f   :  { %1288 = vmatpush1.bf16.msra.mxu0 %v3415_v18  ;;  %v3441_v36 = vld [vmem:[%s4738_s1 + $0x1c4] ss:$16 sps:$4 sm:$0xff]   ;;  %v3445_v38 = vld [vmem:[%s4738_s1 + $0x1c0] ss:$16 sps:$4 sm:$0xff]  }
  0x30   :  { %1331 = vmatpush1.bf16.msra.mxu1 %v3416_v19  ;;  %1289 = vmatprep.subr.bf16.mxu0 %v3417_v20  ;;  %v3443_v37 = vld [vmem:[%s4738_s1 + $0x3c4] ss:$16 sps:$4 sm:$0xff]   ;;  %v3446_v39 = vld [vmem:[%s4738_s1 + $0x3c0] ss:$16 sps:$4 sm:$0xff]   ;;  %v69_v20 = vld [vmem:[%s4737_s0 + $0x68] sm:$0xff] }
  0x31   :  { %1332 = vmatprep.subr.bf16.mxu1 %v3419_v21  ;;  %v3447_v40 = vld [vmem:[%s4738_s1 + $0x1a4] ss:$16 sps:$4 sm:$0xff]   ;;  %v3451_v42 = vld [vmem:[%s4738_s1 + $0x1a0] ss:$16 sps:$4 sm:$0xff]   ;;  %v3977_v21 = vmov 0  }
  0x32   :  { %v3449_v41 = vld [vmem:[%s4738_s1 + $0x3a4] ss:$16 sps:$4 sm:$0xff]   ;;  %v3452_v43 = vld [vmem:[%s4738_s1 + $0x3a0] ss:$16 sps:$4 sm:$0xff]  }
  0x33   :  { %1290 = vmatpush1.bf16.msra.mxu0 %v3421_v22  ;;  %v3453_v44 = vld [vmem:[%s4738_s1 + $0x184] ss:$16 sps:$4 sm:$0xff]   ;;  %v3457_v50 = vld [vmem:[%s4738_s1 + $0x180] ss:$16 sps:$4 sm:$0xff]  }
  0x34   :  { %1333 = vmatpush1.bf16.msra.mxu1 %v3422_v23  ;;  %1291 = vmatprep.subr.bf16.mxu0 %v3423_v24  ;;  %v3455_v45 = vld [vmem:[%s4738_s1 + $0x384] ss:$16 sps:$4 sm:$0xff]   ;;  %v3458_v51 = vld [vmem:[%s4738_s1 + $0x380] ss:$16 sps:$4 sm:$0xff]   ;;  %v3492_v24 = vld [vmem:[%s4738_s1 + $0xe8] ss:$16 sps:$4 sm:$0xff]  }
  0x35   :  { %1334 = vmatprep.subr.bf16.mxu1 %v3425_v25  ;;  %v64_v47 = vld [vmem:[%s4737_s0 + $0x40] sm:$0xff]  ;;  %v66_v49 = vld [vmem:[%s4737_s0 + $0x50] sm:$0xff] }
  0x36   :  { %v3459_v52 = vld [vmem:[%s4738_s1 + $0x164] ss:$16 sps:$4 sm:$0xff]   ;;  %v4186_v53 = vpack.c.bf16 %v64_v47, %v57_v46  ;;  %v4188_v54 = vpack.c.bf16 %v66_v49, %v59_v48  ;;  %v3463_v56 = vld [vmem:[%s4738_s1 + $0x160] ss:$16 sps:$4 sm:$0xff]   ;;  %v3522_v47 = vld [vmem:[%s4738_s1 + $0x48] ss:$16 sps:$4 sm:$0xff]  }
  0x37   :  { %1292 = vmatpush1.bf16.msra.mxu0 %v3427_v26  ;;  %v3461_v55 = vld [vmem:[%s4738_s1 + $0x364] ss:$16 sps:$4 sm:$0xff]   ;;  %v3464_v57 = vld [vmem:[%s4738_s1 + $0x360] ss:$16 sps:$4 sm:$0xff]   ;;  %v3500_v26 = vld [vmem:[%s4738_s1 + $0xcc] ss:$16 sps:$4 sm:$0xff]  }
  0x38   :  { %1335 = vmatpush1.bf16.msra.mxu1 %v3428_v27  ;;  %1293 = vmatprep.subr.bf16.mxu0 %v3429_v28  ;;  %v3465_v58 = vld [vmem:[%s4738_s1 + $0x144] ss:$16 sps:$4 sm:$0xff]   ;;  %v3469_v60 = vld [vmem:[%s4738_s1 + $0x140] ss:$16 sps:$4 sm:$0xff]   ;;  %v3498_v28 = vld [vmem:[%s4738_s1 + $0xc8] ss:$16 sps:$4 sm:$0xff]  }
  0x39   :  { %1336 = vmatprep.subr.bf16.mxu1 %v3431_v29  ;;  %1311 = vmatprep.mubr.bf16.mxu0 %v4186_v53  ;;  %v3467_v59 = vld [vmem:[%s4738_s1 + $0x344] ss:$16 sps:$4 sm:$0xff]   ;;  %v3470_v61 = vld [vmem:[%s4738_s1 + $0x340] ss:$16 sps:$4 sm:$0xff]   ;;  %v3530_v49 = vld [vmem:[%s4738_s1 + $0x2c] ss:$16 sps:$4 sm:$0xff]  }
  0x3a   :  { %1354 = vmatprep.mubr.bf16.mxu1 %v4188_v54  ;;  %v3471_v62 = vld [vmem:[%s4738_s1 + $0x124] ss:$16 sps:$4 sm:$0xff]   ;;  %v3475_v0 = vld [vmem:[%s4738_s1 + $0x120] ss:$16 sps:$4 sm:$0xff]  }
  0x3b   :  { %1294 = vmatpush1.bf16.msra.mxu0 %v3433_v30  ;;  %v3473_v63 = vld [vmem:[%s4738_s1 + $0x324] ss:$16 sps:$4 sm:$0xff]   ;;  %v3476_v1 = vld [vmem:[%s4738_s1 + $0x320] ss:$16 sps:$4 sm:$0xff]   ;;  %v3506_v30 = vld [vmem:[%s4738_s1 + $0xac] ss:$16 sps:$4 sm:$0xff]  }
  0x3c   :  { %1337 = vmatpush1.bf16.msra.mxu1 %v3434_v31  ;;  %1295 = vmatprep.subr.bf16.mxu0 %v3435_v32  ;;  %v3477_v2 = vld [vmem:[%s4738_s1 + $0x104] ss:$16 sps:$4 sm:$0xff]   ;;  %v3481_v4 = vld [vmem:[%s4738_s1 + $0x100] ss:$16 sps:$4 sm:$0xff]   ;;  %v3504_v32 = vld [vmem:[%s4738_s1 + $0xa8] ss:$16 sps:$4 sm:$0xff]  }
  0x3d   :  { %1338 = vmatprep.subr.bf16.mxu1 %v3437_v33  ;;  %v3479_v3 = vld [vmem:[%s4738_s1 + $0x304] ss:$16 sps:$4 sm:$0xff]   ;;  %v3482_v5 = vld [vmem:[%s4738_s1 + $0x300] ss:$16 sps:$4 sm:$0xff]  }
  0x3e   :  { %v56_v6 = vld [vmem:[%s4737_s0] sm:$0xff]  ;;  %v58_v8 = vld [vmem:[%s4737_s0 + $0x10] sm:$0xff] }
  0x3f   :  { %1296 = vmatpush2.bf16.msra.mxu0 %v3439_v34  ;;  %v3485_v10 = vld [vmem:[%s4738_s1 + $0x4e4] ss:$16 sps:$4 sm:$0xff]   ;;  %v4255_v12 = vpack.c.bf16 %v63_v7, %v56_v6  ;;  %v4257_v13 = vpack.c.bf16 %v65_v9, %v58_v8  ;;  %v3483_v14 = vld [vmem:[%s4738_s1 + $0x4e0] ss:$16 sps:$4 sm:$0xff]   ;;  %v3512_v34 = vld [vmem:[%s4738_s1 + $0x8c] ss:$16 sps:$4 sm:$0xff]  }
  0x40   :  { %1339 = vmatpush2.bf16.msra.mxu1 %v3440_v35  ;;  %1297 = vmatprep.subr.bf16.mxu0 %v3441_v36  ;;  %v3488_v11 = vld [vmem:[%s4738_s1 + $0x604] ss:$16 sps:$4 sm:$0xff]   ;;  %v3486_v15 = vld [vmem:[%s4738_s1 + $0x600] ss:$16 sps:$4 sm:$0xff]   ;;  %v3510_v36 = vld [vmem:[%s4738_s1 + $0x88] ss:$16 sps:$4 sm:$0xff]  }
  0x41   :  { %1340 = vmatprep.subr.bf16.mxu1 %v3443_v37  ;;  %v3491_v16 = vld [vmem:[%s4738_s1 + $0x4c4] ss:$16 sps:$4 sm:$0xff]   ;;  %v3489_v18 = vld [vmem:[%s4738_s1 + $0x4c0] ss:$16 sps:$4 sm:$0xff]   ;;  %v3560_v6 = vld [vmem:[%s4738_s1 + $0x18c] ss:$16 sps:$4 sm:$0xff]  }
  0x42   :  { %v62_v19 = vld [vmem:[%s4737_s0 + $0x30] sm:$0xff]  ;;  %v3558_v8 = vld [vmem:[%s4738_s1 + $0x188] ss:$16 sps:$4 sm:$0xff]  }
  0x43   :  { %1298 = vmatpush2.bf16.msra.mxu0 %v3445_v38  ;;  %v3497_v22 = vld [vmem:[%s4738_s1 + $0x4a4] ss:$16 sps:$4 sm:$0xff]   ;;  %v4286_v23 = vpack.c.bf16 %v69_v20, %v62_v19  ;;  %v3495_v25 = vld [vmem:[%s4738_s1 + $0x4a0] ss:$16 sps:$4 sm:$0xff]   ;;  %v3518_v38 = vld [vmem:[%s4738_s1 + $0x6c] ss:$16 sps:$4 sm:$0xff]  }
  0x44   :  { %1341 = vmatpush2.bf16.msra.mxu1 %v3446_v39  ;;  %1299 = vmatprep.subr.bf16.mxu0 %v3447_v40  ;;  %v3503_v27 = vld [vmem:[%s4738_s1 + $0x484] ss:$16 sps:$4 sm:$0xff]   ;;  %v3501_v29 = vld [vmem:[%s4738_s1 + $0x480] ss:$16 sps:$4 sm:$0xff]   ;;  %v3516_v40 = vld [vmem:[%s4738_s1 + $0x68] ss:$16 sps:$4 sm:$0xff]  }
  0x45   :  { %1342 = vmatprep.subr.bf16.mxu1 %v3449_v41  ;;  %v3509_v31 = vld [vmem:[%s4738_s1 + $0x464] ss:$16 sps:$4 sm:$0xff]   ;;  %v3507_v33 = vld [vmem:[%s4738_s1 + $0x460] ss:$16 sps:$4 sm:$0xff]   ;;  %v61_v41 = vld [vmem:[%s4737_s0 + $0x28] sm:$0xff] }
  0x46   :  { %v3515_v35 = vld [vmem:[%s4738_s1 + $0x444] ss:$16 sps:$4 sm:$0xff]   ;;  %v3513_v37 = vld [vmem:[%s4738_s1 + $0x440] ss:$16 sps:$4 sm:$0xff]  }
  0x47   :  { %1300 = vmatpush2.bf16.msra.mxu0 %v3451_v42  ;;  %v3521_v39 = vld [vmem:[%s4738_s1 + $0x424] ss:$16 sps:$4 sm:$0xff]   ;;  %v3525_v48 = vld [vmem:[%s4738_s1 + $0x400] ss:$16 sps:$4 sm:$0xff]  }
  0x48   :  { %1343 = vmatpush2.bf16.msra.mxu1 %v3452_v43  ;;  %1301 = vmatprep.subr.bf16.mxu0 %v3453_v44  ;;  %v68_v42 = vld [vmem:[%s4737_s0 + $0x60] sm:$0xff] }
  0x49   :  { %1344 = vmatprep.subr.bf16.mxu1 %v3455_v45  ;;  %v3519_v43 = vld [vmem:[%s4738_s1 + $0x420] ss:$16 sps:$4 sm:$0xff]   ;;  %v4351_v44 = vpack.c.bf16 %v68_v42, %v61_v41  ;;  %v3524_v45 = vld [vmem:[%s4738_s1 + $0x4c] ss:$16 sps:$4 sm:$0xff]   ;;  %v3527_v46 = vld [vmem:[%s4738_s1 + $0x404] ss:$16 sps:$4 sm:$0xff]  }
  0x4a   :  { %v3563_v7 = vld [vmem:[%s4738_s1 + $0x544] ss:$16 sps:$4 sm:$0xff]   ;;  %v3561_v9 = vld [vmem:[%s4738_s1 + $0x540] ss:$16 sps:$4 sm:$0xff]   ;;  %v3605_v41 = vld [vmem:[%s4738_s1 + $0x26c] ss:$16 sps:$4 sm:$0xff]  }
  0x4b   :  { %1302 = vmatpush2.bf16.msra.mxu0 %v3457_v50  ;;  %v3533_v50 = vld [vmem:[%s4738_s1 + $0x5e4] ss:$16 sps:$4 sm:$0xff]   ;;  %v3573_v19 = vld [vmem:[%s4738_s1 + $0x500] ss:$16 sps:$4 sm:$0xff]   ;;  %v3600_v42 = vld [vmem:[%s4738_s1 + $0x4a8] ss:$16 sps:$4 sm:$0xff]  }
  0x4c   :  { %1345 = vmatpush2.bf16.msra.mxu1 %v3458_v51  ;;  %1303 = vmatprep.subr.bf16.mxu0 %v3459_v52  ;;  %v3528_v51 = vld [vmem:[%s4738_s1 + $0x28] ss:$16 sps:$4 sm:$0xff]   ;;  %v3531_v52 = vld [vmem:[%s4738_s1 + $0x5e0] ss:$16 sps:$4 sm:$0xff]  }
  0x4d   :  { %1346 = vmatprep.subr.bf16.mxu1 %v3461_v55  ;;  %v3539_v55 = vld [vmem:[%s4738_s1 + $0x5c4] ss:$16 sps:$4 sm:$0xff]  }
  0x4e   :  { %v60_v20 = vld [vmem:[%s4737_s0 + $0x20] sm:$0xff] }
  0x4f   :  { %1304 = vmatpush2.bf16.msra.mxu0 %v3463_v56  ;;  %v3534_v56 = vld [vmem:[%s4738_s1 + $0x8] ss:$16 sps:$4 sm:$0xff]  }
  0x50   :  { %1347 = vmatpush2.bf16.msra.mxu1 %v3464_v57  ;;  %1305 = vmatprep.subr.bf16.mxu0 %v3465_v58  ;;  %v3537_v57 = vld [vmem:[%s4738_s1 + $0x5c0] ss:$16 sps:$4 sm:$0xff]   ;;  %v3542_v58 = vld [vmem:[%s4738_s1 + $0x1ec] ss:$16 sps:$4 sm:$0xff]  }
  0x51   :  { %1348 = vmatprep.subr.bf16.mxu1 %v3467_v59  ;;  %v3545_v59 = vld [vmem:[%s4738_s1 + $0x5a4] ss:$16 sps:$4 sm:$0xff]  }
  0x53   :  { %1306 = vmatpush2.bf16.msra.mxu0 %v3469_v60  ;;  %v3540_v60 = vld [vmem:[%s4738_s1 + $0x1e8] ss:$16 sps:$4 sm:$0xff]  }
  0x54   :  { %1349 = vmatpush2.bf16.msra.mxu1 %v3470_v61  ;;  %1307 = vmatprep.subr.bf16.mxu0 %v3471_v62  ;;  %v3543_v61 = vld [vmem:[%s4738_s1 + $0x5a0] ss:$16 sps:$4 sm:$0xff]   ;;  %v3548_v62 = vld [vmem:[%s4738_s1 + $0x1cc] ss:$16 sps:$4 sm:$0xff]  }
  0x55   :  { %1350 = vmatprep.subr.bf16.mxu1 %v3473_v63  ;;  %v3551_v63 = vld [vmem:[%s4738_s1 + $0x584] ss:$16 sps:$4 sm:$0xff]  }
  0x57   :  { %1308 = vmatpush2.bf16.msra.mxu0 %v3475_v0  ;;  %v3546_v0 = vld [vmem:[%s4738_s1 + $0x1c8] ss:$16 sps:$4 sm:$0xff]  }
  0x58   :  { %1351 = vmatpush2.bf16.msra.mxu1 %v3476_v1  ;;  %1309 = vmatprep.subr.bf16.mxu0 %v3477_v2  ;;  %v3549_v1 = vld [vmem:[%s4738_s1 + $0x580] ss:$16 sps:$4 sm:$0xff]   ;;  %v3554_v2 = vld [vmem:[%s4738_s1 + $0x1ac] ss:$16 sps:$4 sm:$0xff]  }
  0x59   :  { %1352 = vmatprep.subr.bf16.mxu1 %v3479_v3  ;;  %v3557_v3 = vld [vmem:[%s4738_s1 + $0x564] ss:$16 sps:$4 sm:$0xff]  }
  0x5b   :  { %1310 = vmatpush2.bf16.msra.mxu0 %v3481_v4  ;;  %v3552_v4 = vld [vmem:[%s4738_s1 + $0x1a8] ss:$16 sps:$4 sm:$0xff]  }
  0x5c   :  { %1353 = vmatpush2.bf16.msra.mxu1 %v3482_v5  ;;  %1365 = vmatprep.subr.bf16.mxu0 %v3485_v10  ;;  %v3555_v5 = vld [vmem:[%s4738_s1 + $0x560] ss:$16 sps:$4 sm:$0xff]   ;;  %v3566_v10 = vld [vmem:[%s4738_s1 + $0x16c] ss:$16 sps:$4 sm:$0xff]  }
  0x5d   :  { %1422 = vmatprep.subr.bf16.mxu1 %v3488_v11  ;;  %v3569_v11 = vld [vmem:[%s4738_s1 + $0x524] ss:$16 sps:$4 sm:$0xff]  }
  0x5e   :  { %1312 = vmatmul.mubr.bf16.vlgmr.msra.gmra.mxu0 %v4255_v12 }
  0x5f   :  { %1355 = vmatmul.mubr.bf16.vlgmr.msra.gmra.mxu1 %v4257_v13  ;;  %1366 = vmatpush1.bf16.msra.mxu0 %v3483_v14  ;;  %v3564_v14 = vld [vmem:[%s4738_s1 + $0x168] ss:$16 sps:$4 sm:$0xff]  }
  0x60   :  { %1423 = vmatpush1.bf16.msra.mxu1 %v3486_v15  ;;  %1367 = vmatprep.subr.bf16.mxu0 %v3491_v16  ;;  %v3567_v15 = vld [vmem:[%s4738_s1 + $0x520] ss:$16 sps:$4 sm:$0xff]   ;;  %v3572_v16 = vld [vmem:[%s4738_s1 + $0x14c] ss:$16 sps:$4 sm:$0xff]  }
  0x61   :  { %1440 = vmatprep.mubr.bf16.mxu1 %v3977_v21  ;;  %1451 = vmatprep.subr.bf16.mxu1 %v3494_v17  ;;  %v3575_v17 = vld [vmem:[%s4738_s1 + $0x504] ss:$16 sps:$4 sm:$0xff]  }
  0x62   :  { %1397 = vmatprep.mubr.bf16.mxu0 %v4351_v44 }
  0x63   :  { %1368 = vmatpush1.bf16.msra.mxu0 %v3489_v18  ;;  %v3570_v18 = vld [vmem:[%s4738_s1 + $0x148] ss:$16 sps:$4 sm:$0xff]  }
  0x64   :  { %1369 = vmatprep.subr.bf16.mxu0 %v3497_v22  ;;  %v67_v22 = vld [vmem:[%s4737_s0 + $0x58] sm:$0xff] }
  0x67   :  { %3170 = vmatmul.mubr.msk.bf16.vlgmr.msra.gmra.mxu1 %vm1275_vm0, %v4286_v23  ;;  %1370 = vmatpush1.bf16.msra.mxu0 %v3495_v25  ;;  %v3581_v25 = vld [vmem:[%s4738_s1 + $0x2ec] ss:$16 sps:$4 sm:$0xff]  }
  0x68   :  { %1452 = vmatpush1.bf16.msra.mxu1 %v3492_v24  ;;  %1371 = vmatprep.subr.bf16.mxu0 %v3503_v27  ;;  %v3578_v24 = vld [vmem:[%s4738_s1 + $0x12c] ss:$16 sps:$4 sm:$0xff]   ;;  %v3576_v27 = vld [vmem:[%s4738_s1 + $0x128] ss:$16 sps:$4 sm:$0xff]  }
  0x69   :  { %1453 = vmatprep.subr.bf16.mxu1 %v3500_v26  ;;  %1483 = vmatprep.mubr.bf16.mxu1 %v4186_v53  ;;  %v3536_v53 = vld [vmem:[%s4738_s1 + $0xc] ss:$16 sps:$4 sm:$0xff]   ;;  %v4474_v26 = vpack.c.bf16 %v67_v22, %v60_v20  ;;  %v3660_v20 = vld [vmem:[%s4738_s1 + $0x568] ss:$16 sps:$4 sm:$0xff]  }
  0x6a   :  { %v3663_v22 = vld [vmem:[%s4738_s1 + $0x328] ss:$16 sps:$4 sm:$0xff]  }
  0x6b   :  { %1372 = vmatpush1.bf16.msra.mxu0 %v3501_v29  ;;  %v3584_v29 = vld [vmem:[%s4738_s1 + $0x10c] ss:$16 sps:$4 sm:$0xff]  }
  0x6c   :  { %1454 = vmatpush1.bf16.msra.mxu1 %v3498_v28  ;;  %1373 = vmatprep.subr.bf16.mxu0 %v3509_v31  ;;  %v3579_v28 = vld [vmem:[%s4738_s1 + $0x2e8] ss:$16 sps:$4 sm:$0xff]  }
  0x6d   :  { %1455 = vmatprep.subr.bf16.mxu1 %v3506_v30  ;;  %v3587_v30 = vld [vmem:[%s4738_s1 + $0x2cc] ss:$16 sps:$4 sm:$0xff]   ;;  %v3582_v31 = vld [vmem:[%s4738_s1 + $0x108] ss:$16 sps:$4 sm:$0xff]  }
  0x6f   :  { %1374 = vmatpush1.bf16.msra.mxu0 %v3507_v33  ;;  %v3590_v33 = vld [vmem:[%s4738_s1 + $0x4ec] ss:$16 sps:$4 sm:$0xff]  }
  0x70   :  { %1456 = vmatpush1.bf16.msra.mxu1 %v3504_v32  ;;  %1375 = vmatprep.subr.bf16.mxu0 %v3515_v35  ;;  %v3585_v32 = vld [vmem:[%s4738_s1 + $0x2c8] ss:$16 sps:$4 sm:$0xff]  }
  0x71   :  { %1457 = vmatprep.subr.bf16.mxu1 %v3512_v34  ;;  %v3593_v34 = vld [vmem:[%s4738_s1 + $0x2ac] ss:$16 sps:$4 sm:$0xff]   ;;  %v3588_v35 = vld [vmem:[%s4738_s1 + $0x4e8] ss:$16 sps:$4 sm:$0xff]  }
  0x73   :  { %1376 = vmatpush1.bf16.msra.mxu0 %v3513_v37  ;;  %v3596_v37 = vld [vmem:[%s4738_s1 + $0x4cc] ss:$16 sps:$4 sm:$0xff]  }
  0x74   :  { %1458 = vmatpush1.bf16.msra.mxu1 %v3510_v36  ;;  %1377 = vmatprep.subr.bf16.mxu0 %v3521_v39  ;;  %v3591_v36 = vld [vmem:[%s4738_s1 + $0x2a8] ss:$16 sps:$4 sm:$0xff]  }
  0x75   :  { %1459 = vmatprep.subr.bf16.mxu1 %v3518_v38  ;;  %v3599_v38 = vld [vmem:[%s4738_s1 + $0x28c] ss:$16 sps:$4 sm:$0xff]   ;;  %v3594_v39 = vld [vmem:[%s4738_s1 + $0x4c8] ss:$16 sps:$4 sm:$0xff]  }
  0x77   :  { %1378 = vmatpush1.bf16.msra.mxu0 %v3519_v43  ;;  %v3608_v43 = vld [vmem:[%s4738_s1 + $0x48c] ss:$16 sps:$4 sm:$0xff]  }
  0x78   :  { %1460 = vmatpush1.bf16.msra.mxu1 %v3516_v40  ;;  %1379 = vmatprep.subr.bf16.mxu0 %v3527_v46  ;;  %v3602_v40 = vld [vmem:[%s4738_s1 + $0x4ac] ss:$16 sps:$4 sm:$0xff]   ;;  %v3606_v46 = vld [vmem:[%s4738_s1 + $0x488] ss:$16 sps:$4 sm:$0xff]  }
  0x79   :  { %1461 = vmatprep.subr.bf16.mxu1 %v3524_v45  ;;  %v3611_v45 = vld [vmem:[%s4738_s1 + $0x24c] ss:$16 sps:$4 sm:$0xff]  }
  0x7b   :  { %1380 = vmatpush1.bf16.msra.mxu0 %v3525_v48  ;;  %v3617_v48 = vld [vmem:[%s4738_s1 + $0x22c] ss:$16 sps:$4 sm:$0xff]  }
  0x7c   :  { %1462 = vmatpush1.bf16.msra.mxu1 %v3522_v47  ;;  %1381 = vmatprep.subr.bf16.mxu0 %v3533_v50  ;;  %v3614_v47 = vld [vmem:[%s4738_s1 + $0x46c] ss:$16 sps:$4 sm:$0xff]   ;;  %v3615_v50 = vld [vmem:[%s4738_s1 + $0x228] ss:$16 sps:$4 sm:$0xff]  }
  0x7d   :  { %1463 = vmatprep.subr.bf16.mxu1 %v3530_v49  ;;  %v3612_v49 = vld [vmem:[%s4738_s1 + $0x468] ss:$16 sps:$4 sm:$0xff]  }
  0x7f   :  { %1382 = vmatpush2.bf16.msra.mxu0 %v3531_v52  ;;  %v3623_v52 = vld [vmem:[%s4738_s1 + $0x20c] ss:$16 sps:$4 sm:$0xff]  }
  0x80   :  { %1464 = vmatpush1.bf16.msra.mxu1 %v3528_v51  ;;  %1383 = vmatprep.subr.bf16.mxu0 %v3539_v55  ;;  %v3620_v51 = vld [vmem:[%s4738_s1 + $0x44c] ss:$16 sps:$4 sm:$0xff]   ;;  %v3621_v55 = vld [vmem:[%s4738_s1 + $0x208] ss:$16 sps:$4 sm:$0xff]  }
  0x81   :  { %1465 = vmatprep.subr.bf16.mxu1 %v3536_v53  ;;  %v3618_v53 = vld [vmem:[%s4738_s1 + $0x448] ss:$16 sps:$4 sm:$0xff]  }
  0x83   :  { %1384 = vmatpush2.bf16.msra.mxu0 %v3537_v57  ;;  %v3629_v57 = vld [vmem:[%s4738_s1 + $0x3ec] ss:$16 sps:$4 sm:$0xff]  }
  0x84   :  { %1466 = vmatpush1.bf16.msra.mxu1 %v3534_v56  ;;  %1385 = vmatprep.subr.bf16.mxu0 %v3545_v59  ;;  %v3626_v56 = vld [vmem:[%s4738_s1 + $0x42c] ss:$16 sps:$4 sm:$0xff]   ;;  %v3627_v59 = vld [vmem:[%s4738_s1 + $0x3e8] ss:$16 sps:$4 sm:$0xff]  }
  0x85   :  { %1467 = vmatprep.subr.bf16.mxu1 %v3542_v58  ;;  %v3624_v58 = vld [vmem:[%s4738_s1 + $0x428] ss:$16 sps:$4 sm:$0xff]  }
  0x87   :  { %1386 = vmatpush2.bf16.msra.mxu0 %v3543_v61  ;;  %v3635_v61 = vld [vmem:[%s4738_s1 + $0x3cc] ss:$16 sps:$4 sm:$0xff]  }
  0x88   :  { %1468 = vmatpush2.bf16.msra.mxu1 %v3540_v60  ;;  %1387 = vmatprep.subr.bf16.mxu0 %v3551_v63  ;;  %v3632_v60 = vld [vmem:[%s4738_s1 + $0x40c] ss:$16 sps:$4 sm:$0xff]   ;;  %v3633_v63 = vld [vmem:[%s4738_s1 + $0x3c8] ss:$16 sps:$4 sm:$0xff]  }
  0x89   :  { %1469 = vmatprep.subr.bf16.mxu1 %v3548_v62  ;;  %v3630_v62 = vld [vmem:[%s4738_s1 + $0x408] ss:$16 sps:$4 sm:$0xff]  }
  0x8b   :  { %1388 = vmatpush2.bf16.msra.mxu0 %v3549_v1  ;;  %v3641_v1 = vld [vmem:[%s4738_s1 + $0x3ac] ss:$16 sps:$4 sm:$0xff]  }
  0x8c   :  { %1470 = vmatpush2.bf16.msra.mxu1 %v3546_v0  ;;  %1389 = vmatprep.subr.bf16.mxu0 %v3557_v3  ;;  %v3638_v0 = vld [vmem:[%s4738_s1 + $0x5ec] ss:$16 sps:$4 sm:$0xff]   ;;  %v3639_v3 = vld [vmem:[%s4738_s1 + $0x3a8] ss:$16 sps:$4 sm:$0xff]  }
  0x8d   :  { %1471 = vmatprep.subr.bf16.mxu1 %v3554_v2  ;;  %v3636_v2 = vld [vmem:[%s4738_s1 + $0x5e8] ss:$16 sps:$4 sm:$0xff]  }
  0x8f   :  { %1390 = vmatpush2.bf16.msra.mxu0 %v3555_v5  ;;  %v3647_v5 = vld [vmem:[%s4738_s1 + $0x38c] ss:$16 sps:$4 sm:$0xff]  }
  0x90   :  { %1472 = vmatpush2.bf16.msra.mxu1 %v3552_v4  ;;  %1391 = vmatprep.subr.bf16.mxu0 %v3563_v7  ;;  %v3644_v4 = vld [vmem:[%s4738_s1 + $0x5cc] ss:$16 sps:$4 sm:$0xff]   ;;  %v3645_v7 = vld [vmem:[%s4738_s1 + $0x388] ss:$16 sps:$4 sm:$0xff]  }
  0x91   :  { %1473 = vmatprep.subr.bf16.mxu1 %v3560_v6  ;;  %v3642_v6 = vld [vmem:[%s4738_s1 + $0x5c8] ss:$16 sps:$4 sm:$0xff]  }
  0x93   :  { %1392 = vmatpush2.bf16.msra.mxu0 %v3561_v9  ;;  %v3653_v9 = vld [vmem:[%s4738_s1 + $0x36c] ss:$16 sps:$4 sm:$0xff]  }
  0x94   :  { %1474 = vmatpush2.bf16.msra.mxu1 %v3558_v8  ;;  %1393 = vmatprep.subr.bf16.mxu0 %v3569_v11  ;;  %v3650_v8 = vld [vmem:[%s4738_s1 + $0x5ac] ss:$16 sps:$4 sm:$0xff]   ;;  %v3651_v11 = vld [vmem:[%s4738_s1 + $0x368] ss:$16 sps:$4 sm:$0xff]  }
  0x95   :  { %1475 = vmatprep.subr.bf16.mxu1 %v3566_v10  ;;  %v3648_v10 = vld [vmem:[%s4738_s1 + $0x5a8] ss:$16 sps:$4 sm:$0xff]  }
  0x97   :  { %1394 = vmatpush2.bf16.msra.mxu0 %v3567_v15  ;;  %v3659_v15 = vld [vmem:[%s4738_s1 + $0x34c] ss:$16 sps:$4 sm:$0xff]  }
  0x98   :  { %1476 = vmatpush2.bf16.msra.mxu1 %v3564_v14  ;;  %1395 = vmatprep.subr.bf16.mxu0 %v3575_v17  ;;  %v3656_v14 = vld [vmem:[%s4738_s1 + $0x58c] ss:$16 sps:$4 sm:$0xff]   ;;  %v3657_v17 = vld [vmem:[%s4738_s1 + $0x348] ss:$16 sps:$4 sm:$0xff]  }
  0x99   :  { %1477 = vmatprep.subr.bf16.mxu1 %v3572_v16  ;;  %v3654_v16 = vld [vmem:[%s4738_s1 + $0x588] ss:$16 sps:$4 sm:$0xff]  }
  0x9b   :  { %1396 = vmatpush2.bf16.msra.mxu0 %v3573_v19  ;;  %v3665_v19 = vld [vmem:[%s4738_s1 + $0x32c] ss:$16 sps:$4 sm:$0xff]  }
  0x9c   :  { %1478 = vmatpush2.bf16.msra.mxu1 %v3570_v18  ;;  %1494 = vmatprep.subr.bf16.mxu0 %v3581_v25  ;;  %v3662_v18 = vld [vmem:[%s4738_s1 + $0x56c] ss:$16 sps:$4 sm:$0xff]  }
  0x9d   :  { %1479 = vmatprep.subr.bf16.mxu1 %v3578_v24  ;;  %v3668_v24 = vld [vmem:[%s4738_s1 + $0x54c] ss:$16 sps:$4 sm:$0xff]  }
  0x9e   :  { %1398 = vmatmul.mubr.bf16.vlgmr.msra.gmra.mxu0 %v4474_v26  ;;  %v3671_v25 = vld [vmem:[%s4738_s1 + $0x30c] ss:$16 sps:$4 sm:$0xff]  }
  0x9f   :  { %1495 = vmatpush1.bf16.msra.mxu0 %v3579_v28  ;;  %1526 = vmatprep.mubr.bf16.mxu0 %v4188_v54  ;;  %v3597_v54 = vld [vmem:[%s4738_s1 + $0x288] ss:$16 sps:$4 sm:$0xff]  }
  0xa0   :  { %1480 = vmatpush2.bf16.msra.mxu1 %v3576_v27  ;;  %1496 = vmatprep.subr.bf16.mxu0 %v3587_v30  ;;  %v3666_v27 = vld [vmem:[%s4738_s1 + $0x548] ss:$16 sps:$4 sm:$0xff]   ;;  %v3677_v30 = vld [vmem:[%s4738_s1 + $0x60c] ss:$16 sps:$4 sm:$0xff]  }
  0xa1   :  { %1481 = vmatprep.subr.bf16.mxu1 %v3584_v29  ;;  %v3669_v28 = vld [vmem:[%s4738_s1 + $0x308] ss:$16 sps:$4 sm:$0xff]   ;;  %v3674_v29 = vld [vmem:[%s4738_s1 + $0x52c] ss:$16 sps:$4 sm:$0xff]  }
  0xa3   :  { %1497 = vmatpush1.bf16.msra.mxu0 %v3585_v32  ;;  %v3675_v32 = vld [vmem:[%s4738_s1 + $0x608] ss:$16 sps:$4 sm:$0xff]  }
  0xa4   :  { %1482 = vmatpush2.bf16.msra.mxu1 %v3582_v31  ;;  %1498 = vmatprep.subr.bf16.mxu0 %v3593_v34  ;;  %v3672_v31 = vld [vmem:[%s4738_s1 + $0x528] ss:$16 sps:$4 sm:$0xff]   ;;  %v3683_v34 = vld [vmem:[#allocation2 + $0xe4] ss:$16 sps:$4 sm:$0xff]  }
  0xa5   :  { %1537 = vmatprep.subr.bf16.mxu1 %v3590_v33  ;;  %v3680_v33 = vld [vmem:[%s4738_s1 + $0x50c] ss:$16 sps:$4 sm:$0xff]  }
  0xa7   :  { %1484 = vmatmul.mubr.bf16.vlgmr.msra.gmra.mxu1 %v4255_v12  ;;  %1499 = vmatpush1.bf16.msra.mxu0 %v3591_v36  ;;  %v3603_v12 = vld [vmem:[%s4738_s1 + $0x268] ss:$16 sps:$4 sm:$0xff]   ;;  %v3681_v36 = vld [vmem:[#allocation2 + $0xe0] ss:$16 sps:$4 sm:$0xff]  }
  0xa8   :  { %1538 = vmatpush1.bf16.msra.mxu1 %v3588_v35  ;;  %1500 = vmatprep.subr.bf16.mxu0 %v3599_v38  ;;  %v3678_v35 = vld [vmem:[%s4738_s1 + $0x508] ss:$16 sps:$4 sm:$0xff]   ;;  %v3684_v38 = vld [vmem:[#allocation2 + $0xc0] ss:$16 sps:$4 sm:$0xff]  }
  0xa9   :  { %1539 = vmatprep.subr.bf16.mxu1 %v3596_v37  ;;  %1569 = vmatprep.mubr.bf16.mxu1 %v4351_v44  ;;  %v3609_v44 = vld [vmem:[%s4738_s1 + $0x248] ss:$16 sps:$4 sm:$0xff]   ;;  %v3686_v37 = vld [vmem:[#allocation2 + $0xc4] ss:$16 sps:$4 sm:$0xff]  }
  0xab   :  { %1501 = vmatpush1.bf16.msra.mxu0 %v3597_v54  ;;  %v3687_v54 = vld [vmem:[#allocation2 + $0xa0] ss:$16 sps:$4 sm:$0xff]  }
  0xac   :  { %1540 = vmatpush1.bf16.msra.mxu1 %v3594_v39  ;;  %1502 = vmatprep.subr.bf16.mxu0 %v3605_v41  ;;  %v3689_v39 = vld [vmem:[#allocation2 + $0xa4] ss:$16 sps:$4 sm:$0xff]   ;;  %v3693_v41 = vld [vmem:[#allocation2 + $0x60] ss:$16 sps:$4 sm:$0xff]  }
  0xad   :  { %1541 = vmatprep.subr.bf16.mxu1 %v3602_v40  ;;  %v3690_v40 = vld [vmem:[#allocation2 + $0x80] ss:$16 sps:$4 sm:$0xff]  }
  0xaf   :  { %1503 = vmatpush1.bf16.msra.mxu0 %v3603_v12  ;;  %v3737_v12 = vld [vmem:[#allocation2 + $0x2e4] ss:$16 sps:$4 sm:$0xff]  }
  0xb0   :  { %1542 = vmatpush1.bf16.msra.mxu1 %v3600_v42  ;;  %1504 = vmatprep.subr.bf16.mxu0 %v3611_v45  ;;  %v3735_v42 = vld [vmem:[#allocation2 + $0x2e0] ss:$16 sps:$4 sm:$0xff]   ;;  %v3743_v45 = vld [vmem:[#allocation2 + $0x2c4] ss:$16 sps:$4 sm:$0xff]  }
  0xb1   :  { %1543 = vmatprep.subr.bf16.mxu1 %v3608_v43  ;;  %v3741_v43 = vld [vmem:[#allocation2 + $0x2c0] ss:$16 sps:$4 sm:$0xff]  }
  0xb3   :  { %1505 = vmatpush1.bf16.msra.mxu0 %v3609_v44  ;;  %v3699_v44 = vld [vmem:[#allocation2 + $0x20] ss:$16 sps:$4 sm:$0xff]  }
  0xb4   :  { %1544 = vmatpush1.bf16.msra.mxu1 %v3606_v46  ;;  %1506 = vmatprep.subr.bf16.mxu0 %v3617_v48  ;;  %v3701_v46 = vld [vmem:[#allocation2 + $0x24] ss:$16 sps:$4 sm:$0xff]  }
  0xb5   :  { %1545 = vmatprep.subr.bf16.mxu1 %v3614_v47  ;;  %v3747_v47 = vld [vmem:[#allocation2 + $0x2a0] ss:$16 sps:$4 sm:$0xff]   ;;  %v3749_v48 = vld [vmem:[#allocation2 + $0x2a4] ss:$16 sps:$4 sm:$0xff]  }
  0xb7   :  { %1507 = vmatpush1.bf16.msra.mxu0 %v3615_v50  ;;  %v3702_v50 = vld [vmem:[#allocation2] ss:$16 sps:$4 sm:$0xff]  }
  0xb8   :  { %1546 = vmatpush1.bf16.msra.mxu1 %v3612_v49  ;;  %1508 = vmatprep.subr.bf16.mxu0 %v3623_v52  ;;  %v3704_v49 = vld [vmem:[#allocation2 + $0x4] ss:$16 sps:$4 sm:$0xff]  }
  0xb9   :  { %1547 = vmatprep.subr.bf16.mxu1 %v3620_v51  ;;  %v3753_v51 = vld [vmem:[#allocation2 + $0x280] ss:$16 sps:$4 sm:$0xff]   ;;  %v3755_v52 = vld [vmem:[#allocation2 + $0x284] ss:$16 sps:$4 sm:$0xff]  }
  0xbb   :  { %1509 = vmatpush1.bf16.msra.mxu0 %v3621_v55  ;;  %v3705_v55 = vld [vmem:[#allocation2 + $0x1e0] ss:$16 sps:$4 sm:$0xff]  }
  0xbc   :  { %1548 = vmatpush1.bf16.msra.mxu1 %v3618_v53  ;;  %1510 = vmatprep.subr.bf16.mxu0 %v3629_v57  ;;  %v3707_v53 = vld [vmem:[#allocation2 + $0x1e4] ss:$16 sps:$4 sm:$0xff]  }
  0xbd   :  { %1549 = vmatprep.subr.bf16.mxu1 %v3626_v56  ;;  %v3759_v56 = vld [vmem:[#allocation2 + $0x260] ss:$16 sps:$4 sm:$0xff]   ;;  %v3761_v57 = vld [vmem:[#allocation2 + $0x264] ss:$16 sps:$4 sm:$0xff]  }
  0xbf   :  { %1511 = vmatpush2.bf16.msra.mxu0 %v3627_v59  ;;  %v3708_v59 = vld [vmem:[#allocation2 + $0x1c0] ss:$16 sps:$4 sm:$0xff]  }
  0xc0   :  { %1550 = vmatpush1.bf16.msra.mxu1 %v3624_v58  ;;  %1512 = vmatprep.subr.bf16.mxu0 %v3635_v61  ;;  %v3710_v58 = vld [vmem:[#allocation2 + $0x1c4] ss:$16 sps:$4 sm:$0xff]  }
  0xc1   :  { %1551 = vmatprep.subr.bf16.mxu1 %v3632_v60  ;;  %v3765_v60 = vld [vmem:[#allocation2 + $0x240] ss:$16 sps:$4 sm:$0xff]   ;;  %v3767_v61 = vld [vmem:[#allocation2 + $0x244] ss:$16 sps:$4 sm:$0xff]  }
  0xc3   :  { %1513 = vmatpush2.bf16.msra.mxu0 %v3633_v63  ;;  %v3711_v63 = vld [vmem:[#allocation2 + $0x1a0] ss:$16 sps:$4 sm:$0xff]  }
  0xc4   :  { %1552 = vmatpush1.bf16.msra.mxu1 %v3630_v62  ;;  %1514 = vmatprep.subr.bf16.mxu0 %v3641_v1  ;;  %v3713_v62 = vld [vmem:[#allocation2 + $0x1a4] ss:$16 sps:$4 sm:$0xff]  }
  0xc5   :  { %1553 = vmatprep.subr.bf16.mxu1 %v3638_v0  ;;  %v3771_v0 = vld [vmem:[#allocation2 + $0x220] ss:$16 sps:$4 sm:$0xff]   ;;  %v3773_v1 = vld [vmem:[#allocation2 + $0x224] ss:$16 sps:$4 sm:$0xff]  }
  0xc7   :  { %1515 = vmatpush2.bf16.msra.mxu0 %v3639_v3  ;;  %v3714_v3 = vld [vmem:[#allocation2 + $0x180] ss:$16 sps:$4 sm:$0xff]  }
  0xc8   :  { %1554 = vmatpush2.bf16.msra.mxu1 %v3636_v2  ;;  %1516 = vmatprep.subr.bf16.mxu0 %v3647_v5  ;;  %v3716_v2 = vld [vmem:[#allocation2 + $0x184] ss:$16 sps:$4 sm:$0xff]  }
  0xc9   :  { %1555 = vmatprep.subr.bf16.mxu1 %v3644_v4  ;;  %v3777_v4 = vld [vmem:[#allocation2 + $0x200] ss:$16 sps:$4 sm:$0xff]   ;;  %v3779_v5 = vld [vmem:[#allocation2 + $0x204] ss:$16 sps:$4 sm:$0xff]  }
  0xcb   :  { %1517 = vmatpush2.bf16.msra.mxu0 %v3645_v7  ;;  %v3717_v7 = vld [vmem:[#allocation2 + $0x160] ss:$16 sps:$4 sm:$0xff]  }
  0xcc   :  { %1556 = vmatpush2.bf16.msra.mxu1 %v3642_v6  ;;  %1518 = vmatprep.subr.bf16.mxu0 %v3653_v9  ;;  %v3719_v6 = vld [vmem:[#allocation2 + $0x164] ss:$16 sps:$4 sm:$0xff]  }
  0xcd   :  { %1557 = vmatprep.subr.bf16.mxu1 %v3650_v8  ;;  %v3783_v8 = vld [vmem:[#allocation2 + $0x3e0] ss:$16 sps:$4 sm:$0xff]   ;;  %v3785_v9 = vld [vmem:[#allocation2 + $0x3e4] ss:$16 sps:$4 sm:$0xff]  }
  0xcf   :  { %1519 = vmatpush2.bf16.msra.mxu0 %v3651_v11  ;;  %v3720_v11 = vld [vmem:[#allocation2 + $0x140] ss:$16 sps:$4 sm:$0xff]  }
  0xd0   :  { %1558 = vmatpush2.bf16.msra.mxu1 %v3648_v10  ;;  %1520 = vmatprep.subr.bf16.mxu0 %v3659_v15  ;;  %v3722_v10 = vld [vmem:[#allocation2 + $0x144] ss:$16 sps:$4 sm:$0xff]  }
  0xd1   :  { %1559 = vmatprep.subr.bf16.mxu1 %v3656_v14  ;;  %v3789_v14 = vld [vmem:[#allocation2 + $0x3c0] ss:$16 sps:$4 sm:$0xff]   ;;  %v3791_v15 = vld [vmem:[#allocation2 + $0x3c4] ss:$16 sps:$4 sm:$0xff]  }
  0xd3   :  { %1521 = vmatpush2.bf16.msra.mxu0 %v3657_v17  ;;  %v3723_v17 = vld [vmem:[#allocation2 + $0x120] ss:$16 sps:$4 sm:$0xff]  }
  0xd4   :  { %1560 = vmatpush2.bf16.msra.mxu1 %v3654_v16  ;;  %1522 = vmatprep.subr.bf16.mxu0 %v3665_v19  ;;  %v3725_v16 = vld [vmem:[#allocation2 + $0x124] ss:$16 sps:$4 sm:$0xff]  }
  0xd5   :  { %1561 = vmatprep.subr.bf16.mxu1 %v3662_v18  ;;  %v3795_v18 = vld [vmem:[#allocation2 + $0x3a0] ss:$16 sps:$4 sm:$0xff]   ;;  %v3797_v19 = vld [vmem:[#allocation2 + $0x3a4] ss:$16 sps:$4 sm:$0xff]  }
  0xd7   :  { %1523 = vmatpush2.bf16.msra.mxu0 %v3663_v22  ;;  %v3726_v22 = vld [vmem:[#allocation2 + $0x100] ss:$16 sps:$4 sm:$0xff]  }
  0xd8   :  { %1562 = vmatpush2.bf16.msra.mxu1 %v3660_v20  ;;  %1524 = vmatprep.subr.bf16.mxu0 %v3671_v25  ;;  %v3728_v20 = vld [vmem:[#allocation2 + $0x104] ss:$16 sps:$4 sm:$0xff]   ;;  %v3731_v25 = vld [vmem:[#allocation2 + $0xec] ss:$16 sps:$4 sm:$0xff]  }
  0xd9   :  { %1563 = vmatprep.subr.bf16.mxu1 %v3668_v24  ;;  %v3803_v24 = vld [vmem:[#allocation2 + $0x384] ss:$16 sps:$4 sm:$0xff]  }
  0xdb   :  { %1525 = vmatpush2.bf16.msra.mxu0 %v3669_v28  ;;  %v3809_v28 = vld [vmem:[#allocation2 + $0x364] ss:$16 sps:$4 sm:$0xff]  }
  0xdc   :  { %1564 = vmatpush2.bf16.msra.mxu1 %v3666_v27  ;;  %1594 = vmatprep.subr.bf16.mxu0 %v3677_v30  ;;  %v3801_v27 = vld [vmem:[#allocation2 + $0x380] ss:$16 sps:$4 sm:$0xff]   ;;  %v3815_v30 = vld [vmem:[#allocation2 + $0x344] ss:$16 sps:$4 sm:$0xff]  }
  0xdd   :  { %1565 = vmatprep.subr.bf16.mxu1 %v3674_v29  ;;  %v3807_v29 = vld [vmem:[#allocation2 + $0x360] ss:$16 sps:$4 sm:$0xff]  }
  0xde   :  { %1527 = vmatmul.mubr.bf16.vlgmr.msra.gmra.mxu0 %v4257_v13  ;;  %v3692_v13 = vld [vmem:[#allocation2 + $0x84] ss:$16 sps:$4 sm:$0xff]  }
  0xdf   :  { %1595 = vmatpush1.bf16.msra.mxu0 %v3675_v32  ;;  %1612 = vmatprep.mubr.bf16.mxu0 %v3977_v21  ;;  %v3695_v21 = vld [vmem:[#allocation2 + $0x64] ss:$16 sps:$4 sm:$0xff]  }
  0xe0   :  { %1566 = vmatpush2.bf16.msra.mxu1 %v3672_v31  ;;  %2425 = vmatprep.subr.bf16.mxu0 %v3683_v34  ;;  %v3813_v31 = vld [vmem:[#allocation2 + $0x340] ss:$16 sps:$4 sm:$0xff]   ;;  %v3821_v32 = vld [vmem:[#allocation2 + $0x324] ss:$16 sps:$4 sm:$0xff]  }
  0xe1   :  { %1567 = vmatprep.subr.bf16.mxu1 %v3680_v33  ;;  %v3819_v33 = vld [vmem:[#allocation2 + $0x320] ss:$16 sps:$4 sm:$0xff]   ;;  %v3824_v34 = vld [vmem:[#allocation2 + $0x304] ss:$16 sps:$4 sm:$0xff]  }
  0xe4   :  { %1568 = vmatpush2.bf16.msra.mxu1 %v3678_v35  ;;  %v3822_v35 = vld [vmem:[#allocation2 + $0x300] ss:$16 sps:$4 sm:$0xff]  }
  0xe5   :  { %2468 = vmatprep.subr.bf16.mxu1 %v3737_v12  ;;  %v4696_v12 = vld [vmem:[%s4739_s2] sm:$0xf] }
  0xe6   :  { %3171 = vmatmul.mubr.msk.bf16.vlgmr.msra.gmra.mxu0 %vm1275_vm0, %v4286_v23  ;;  %v3696_v23 = vld [vmem:[#allocation2 + $0x40] ss:$16 sps:$4 sm:$0xff]  }
  0xe7   :  { %1570 = vmatmul.mubr.bf16.vlgmr.msra.gmra.mxu1 %v4474_v26  ;;  %2426 = vmatpush1.bf16.msra.mxu0 %v3681_v36  ;;  %v3698_v26 = vld [vmem:[#allocation2 + $0x44] ss:$16 sps:$4 sm:$0xff]   ;;  %v3827_v36 = vld [vmem:[#allocation2 + $0x2ec] ss:$16 sps:$4 sm:$0xff]  }
  0xe8   :  { %2427 = vmatprep.subr.bf16.mxu0 %v3686_v37  ;;  %2469 = vmatpush1.bf16.msra.mxu1 %v3735_v42 }
  0xe9   :  { %2470 = vmatprep.subr.bf16.mxu1 %v3743_v45 }
  0xeb   :  { %2428 = vmatpush1.bf16.msra.mxu0 %v3684_v38  ;;  %v275_v38 = vlaneseq }
  0xec   :  { %2429 = vmatprep.subr.bf16.mxu0 %v3689_v39  ;;  %2471 = vmatpush1.bf16.msra.mxu1 %v3741_v43 }
  0xed   :  { %2472 = vmatprep.subr.bf16.mxu1 %v3749_v48 }
  0xef   :  { %2430 = vmatpush1.bf16.msra.mxu0 %v3687_v54  ;;  %v4689_v54 = vshrl.u32 %v275_v38, 7  ;;  %v3786_v38 = vld [vmem:[#allocation2 + $0x1a8] ss:$16 sps:$4 sm:$0xff]  }
  0xf0   :  { %2431 = vmatprep.subr.bf16.mxu0 %v3692_v13  ;;  %2473 = vmatpush1.bf16.msra.mxu1 %v3747_v47 }
  0xf1   :  { %2474 = vmatprep.subr.bf16.mxu1 %v3755_v52 }
  0xf3   :  { %2432 = vmatpush1.bf16.msra.mxu0 %v3690_v40 }
  0xf4   :  { %2433 = vmatprep.subr.bf16.mxu0 %v3695_v21  ;;  %2475 = vmatpush1.bf16.msra.mxu1 %v3753_v51  ;;  %v281_v21 = vsub.s32 1, %v4689_v54 }
  0xf5   :  { %2476 = vmatprep.subr.bf16.mxu1 %v3761_v57 }
  0xf7   :  { %2434 = vmatpush1.bf16.msra.mxu0 %v3693_v41  ;;  %v277_v41 = vsub.s32 0, %v4689_v54 }
  0xf8   :  { %2435 = vmatprep.subr.bf16.mxu0 %v3698_v26  ;;  %2477 = vmatpush1.bf16.msra.mxu1 %v3759_v56 }
  0xf9   :  { %2478 = vmatprep.subr.bf16.mxu1 %v3767_v61  ;;  %v278_v43 = vrot.slane %v4696_v12, %v277_v41 }
  0xfb   :  { %2436 = vmatpush1.bf16.msra.mxu0 %v3696_v23  ;;  %v282_v23 = vrot.slane %v4696_v12, %v281_v21 }
  0xfc   :  { %2437 = vmatprep.subr.bf16.mxu0 %v3701_v46  ;;  %2479 = vmatpush1.bf16.msra.mxu1 %v3765_v60 }
  0xfd   :  { %2480 = vmatprep.subr.bf16.mxu1 %v3773_v1 }
  0xff   :  { %2438 = vmatpush1.bf16.msra.mxu0 %v3699_v44 }
 0x100   :  { %2439 = vmatprep.subr.bf16.mxu0 %v3704_v49  ;;  %2481 = vmatpush1.bf16.msra.mxu1 %v3771_v0 }
 0x101   :  { %2482 = vmatprep.subr.bf16.mxu1 %v3779_v5 }
 0x103   :  { %2440 = vmatpush1.bf16.msra.mxu0 %v3702_v50 }
 0x104   :  { %2441 = vmatprep.subr.bf16.mxu0 %v3707_v53  ;;  %2483 = vmatpush1.bf16.msra.mxu1 %v3777_v4 }
 0x105   :  { %2484 = vmatprep.subr.bf16.mxu1 %v3785_v9 }
 0x107   :  { %2442 = vmatpush2.bf16.msra.mxu0 %v3705_v55 }
 0x108   :  { %2443 = vmatprep.subr.bf16.mxu0 %v3710_v58  ;;  %2485 = vmatpush2.bf16.msra.mxu1 %v3783_v8 }
 0x109   :  { %2486 = vmatprep.subr.bf16.mxu1 %v3791_v15 }
 0x10b   :  { %2444 = vmatpush2.bf16.msra.mxu0 %v3708_v59 }
 0x10c   :  { %2445 = vmatprep.subr.bf16.mxu0 %v3713_v62  ;;  %2487 = vmatpush2.bf16.msra.mxu1 %v3789_v14  ;;  %v3729_v14 = vld [vmem:[#allocation2 + $0xe8] ss:$16 sps:$4 sm:$0xff]  }
 0x10d   :  { %2488 = vmatprep.subr.bf16.mxu1 %v3797_v19  ;;  %v3738_v19 = vld [vmem:[#allocation2 + $0xa8] ss:$16 sps:$4 sm:$0xff]  }
 0x10f   :  { %2446 = vmatpush2.bf16.msra.mxu0 %v3711_v63 }
 0x110   :  { %2447 = vmatprep.subr.bf16.mxu0 %v3716_v2  ;;  %2489 = vmatpush2.bf16.msra.mxu1 %v3795_v18  ;;  %v3740_v18 = vld [vmem:[#allocation2 + $0xac] ss:$16 sps:$4 sm:$0xff]  }
 0x111   :  { %2490 = vmatprep.subr.bf16.mxu1 %v3803_v24  ;;  %v3752_v24 = vld [vmem:[#allocation2 + $0x6c] ss:$16 sps:$4 sm:$0xff]  }
 0x113   :  { %2448 = vmatpush2.bf16.msra.mxu0 %v3714_v3 }
 0x114   :  { %2449 = vmatprep.subr.bf16.mxu0 %v3719_v6  ;;  %2491 = vmatpush2.bf16.msra.mxu1 %v3801_v27  ;;  %v3758_v27 = vld [vmem:[#allocation2 + $0x4c] ss:$16 sps:$4 sm:$0xff]  }
 0x115   :  { %2492 = vmatprep.subr.bf16.mxu1 %v3809_v28  ;;  %v3756_v28 = vld [vmem:[#allocation2 + $0x48] ss:$16 sps:$4 sm:$0xff]  }
 0x117   :  { %2450 = vmatpush2.bf16.msra.mxu0 %v3717_v7 }
 0x118   :  { %2451 = vmatprep.subr.bf16.mxu0 %v3722_v10  ;;  %2493 = vmatpush2.bf16.msra.mxu1 %v3807_v29  ;;  %v3764_v29 = vld [vmem:[#allocation2 + $0x2c] ss:$16 sps:$4 sm:$0xff]  }
 0x119   :  { %2494 = vmatprep.subr.bf16.mxu1 %v3815_v30  ;;  %v3762_v30 = vld [vmem:[#allocation2 + $0x28] ss:$16 sps:$4 sm:$0xff]  }
 0x11b   :  { %2452 = vmatpush2.bf16.msra.mxu0 %v3720_v11 }
 0x11c   :  { %2453 = vmatprep.subr.bf16.mxu0 %v3725_v16  ;;  %2495 = vmatpush2.bf16.msra.mxu1 %v3813_v31  ;;  %v3734_v16 = vld [vmem:[#allocation2 + $0xcc] ss:$16 sps:$4 sm:$0xff]  }
 0x11d   :  { %2496 = vmatprep.subr.bf16.mxu1 %v3821_v32  ;;  %v3770_v31 = vld [vmem:[#allocation2 + $0xc] ss:$16 sps:$4 sm:$0xff]   ;;  %v3768_v32 = vld [vmem:[#allocation2 + $0x8] ss:$16 sps:$4 sm:$0xff]  }
 0x11e   :  { %v1313_v13 = vpop.f32.mrf.mxu0 }
 0x11f   :  { %2454 = vmatpush2.bf16.msra.mxu0 %v3723_v17  ;;  %v1356_v37 = vpop.f32.mrf.mxu1  ;;  %v1314_v47 = vadd.f32 %v1313_v13, %v278_v43  ;;  %v3732_v17 = vld [vmem:[#allocation2 + $0xc8] ss:$16 sps:$4 sm:$0xff]  }
 0x120   :  { %2455 = vmatprep.subr.bf16.mxu0 %v3728_v20  ;;  %2497 = vmatpush2.bf16.msra.mxu1 %v3819_v33  ;;  %v1315_v42 = vpop.f32.mrf.mxu0  ;;  %v3746_v20 = vld [vmem:[#allocation2 + $0x8c] ss:$16 sps:$4 sm:$0xff]   ;;  %v3792_v13 = vld [vmem:[#allocation2 + $0x188] ss:$16 sps:$4 sm:$0xff]  }
 0x121   :  { %2498 = vmatprep.subr.bf16.mxu1 %v3824_v34  ;;  %v1358_v39 = vpop.f32.mrf.mxu1  ;;  %v1316_v44 = vadd.f32 %v1315_v42, %v282_v23  ;;  %v1357_v55 = vadd.f32 %v1356_v37, %v1314_v47  ;;  %v3776_v33 = vld [vmem:[#allocation2 + $0x1ec] ss:$16 sps:$4 sm:$0xff]   ;;  %v3774_v34 = vld [vmem:[#allocation2 + $0x1e8] ss:$16 sps:$4 sm:$0xff]  }
 0x122   :  { %v1317_v45 = vpop.f32.mrf.mxu0  ;;  %v3788_v37 = vld [vmem:[#allocation2 + $0x1ac] ss:$16 sps:$4 sm:$0xff]   ;;  %v3804_v47 = vld [vmem:[#allocation2 + $0x148] ss:$16 sps:$4 sm:$0xff]  }
 0x123   :  { %2456 = vmatpush2.bf16.msra.mxu0 %v3726_v22  ;;  %v1360_v40 = vpop.f32.mrf.mxu1  ;;  %v1318_v49 = vadd.f32 %v1317_v45, %v278_v43  ;;  %v1359_v52 = vadd.f32 %v1358_v39, %v1316_v44  ;;  %v3744_v22 = vld [vmem:[#allocation2 + $0x88] ss:$16 sps:$4 sm:$0xff]   ;;  %v3794_v39 = vld [vmem:[#allocation2 + $0x18c] ss:$16 sps:$4 sm:$0xff]   ;;  %v289_v45 = vsub.s32 3, %v4689_v54 }
 0x124   :  { %2511 = vmatprep.subr.bf16.mxu0 %v3731_v25  ;;  %2499 = vmatpush2.bf16.msra.mxu1 %v3822_v35  ;;  %v1319_v48 = vpop.f32.mrf.mxu0  ;;  %v3750_v25 = vld [vmem:[#allocation2 + $0x68] ss:$16 sps:$4 sm:$0xff]   ;;  %v3782_v35 = vld [vmem:[#allocation2 + $0x1cc] ss:$16 sps:$4 sm:$0xff]  }
 0x125   :  { %2554 = vmatprep.subr.bf16.mxu1 %v3827_v36  ;;  %v1362_v26 = vpop.f32.mrf.mxu1  ;;  %v1320_v53 = vadd.f32 %v1319_v48, %v282_v23  ;;  %v1361_v57 = vadd.f32 %v1360_v40, %v1318_v49  ;;  %v3780_v36 = vld [vmem:[#allocation2 + $0x1c8] ss:$16 sps:$4 sm:$0xff]   ;;  %v3800_v42 = vld [vmem:[#allocation2 + $0x16c] ss:$16 sps:$4 sm:$0xff]  }
 0x126   :  { %v3806_v43 = vld [vmem:[#allocation2 + $0x14c] ss:$16 sps:$4 sm:$0xff]  }
 0x127   :  { %v1442_v46 = vpop.f32.mrf.mxu1  ;;  %v1363_v62 = vadd.f32 %v1362_v26, %v1320_v53  ;;  %v3798_v26 = vld [vmem:[#allocation2 + $0x168] ss:$16 sps:$4 sm:$0xff]  }
 0x129   :  { %v1444_v50 = vpop.f32.mrf.mxu1 }
 0x12b   :  { %v1446_v59 = vpop.f32.mrf.mxu1 }
 0x12d   :  { %v1448_v4 = vpop.f32.mrf.mxu1 }
 0x15e   :  { %v1399_v51 = vpop.f32.mrf.mxu0 }
 0x15f   :  { %v1400_v60 = vadd.f32 %v1399_v51, %v1357_v55  ;;  %v290_v51 = vrot.slane %v4696_v12, %v289_v45  ;;  %v3810_v55 = vld [vmem:[#allocation2 + $0x128] ss:$16 sps:$4 sm:$0xff]  }
 0x160   :  { %v1401_v56 = vpop.f32.mrf.mxu0 }
 0x161   :  { %v1402_v58 = vadd.f32 %v1401_v56, %v1359_v52  ;;  %v1443_v5 = vadd.f32 %v1442_v46, %v1400_v60  ;;  %v285_v46 = vsub.s32 2, %v4689_v54 }
 0x162   :  { %v1403_v61 = vpop.f32.mrf.mxu0 }
 0x163   :  { %v1404_v63 = vadd.f32 %v1403_v61, %v1361_v57  ;;  %v1445_v1 = vadd.f32 %v1444_v50, %v1402_v58  ;;  %v1623_v10 = vmax.f32 %v1443_v5, 0.0  ;;  %v3812_v50 = vld [vmem:[#allocation2 + $0x12c] ss:$16 sps:$4 sm:$0xff]   ;;  %v286_v52 = vrot.slane %v4696_v12, %v285_v46 }
 0x164   :  { %v1405_v0 = vpop.f32.mrf.mxu0  ;;  %v3818_v58 = vld [vmem:[#allocation2 + $0x10c] ss:$16 sps:$4 sm:$0xff]  }
 0x165   :  { %v1447_v2 = vadd.f32 %v1446_v59, %v1404_v63  ;;  %v1406_v3 = vadd.f32 %v1405_v0, %v1363_v62  ;;  %v1624_v8 = vmax.f32 %v1445_v1, 0.0  ;;  %v3816_v1 = vld [vmem:[#allocation2 + $0x108] ss:$16 sps:$4 sm:$0xff]  }
 0x167   :  { %v1449_v6 = vadd.f32 %v1448_v4, %v1406_v3  ;;  %v1627_v7 = vmax.f32 %v1447_v2, 0.0  ;;  %v1485_v40 = vpop.f32.mrf.mxu1 }
 0x168   :  { %v1486_v60 = vadd.f32 %v1485_v40, %v286_v52  ;;  %v3878_v40 = vld [vmem:[#allocation5 + $0x28] sm:$0xff]  }
 0x169   :  { %v1628_v9 = vmax.f32 %v1449_v6, 0.0  ;;  %v4704_v15 = vpack.c.bf16 %v1627_v7, %v1623_v10  ;;  %v1487_v23 = vpop.f32.mrf.mxu1 }
 0x16a   :  { %v1488_v59 = vadd.f32 %v1487_v23, %v290_v51  ;;  %v3837_v23 = vld [vmem:[#allocation2 + $0x268] ss:$16 sps:$4 sm:$0xff]  }
 0x16b   :  { %v1632_v11 = vpack.c.bf16 %v1628_v9, %v1624_v8  ;;  %v1489_v48 = vpop.f32.mrf.mxu1 }
 0x16c   :  { %v1490_v63 = vadd.f32 %v1489_v48, %v286_v52  ;;  %v3843_v48 = vld [vmem:[#allocation2 + $0x228] ss:$16 sps:$4 sm:$0xff]  }
 0x16d   :  { %2457 = vmatprep.mubr.bf16.mxu0 %v1632_v11  ;;  %v1491_v56 = vpop.f32.mrf.mxu1  ;;  %v3849_v52 = vld [vmem:[#allocation2 + $0x3e8] ss:$16 sps:$4 sm:$0xff]  }
 0x16e   :  { %2458 = vmatmul.mubr.bf16.vlgmr.msra.gmra.mxu0 %v4704_v15  ;;  %v1492_v12 = vadd.f32 %v1491_v56, %v290_v51  ;;  %v3851_v51 = vld [vmem:[#allocation2 + $0x3ec] ss:$16 sps:$4 sm:$0xff]  }
 0x16f   :  { %2512 = vmatpush1.bf16.msra.mxu0 %v3729_v14  ;;  %2543 = vmatprep.mubr.bf16.mxu0 %v1632_v11  ;;  %v3857_v56 = vld [vmem:[#allocation2 + $0x3ac] ss:$16 sps:$4 sm:$0xff]  }
 0x170   :  { %2513 = vmatprep.subr.bf16.mxu0 %v3734_v16 }
 0x173   :  { %2514 = vmatpush1.bf16.msra.mxu0 %v3732_v17 }
 0x174   :  { %2515 = vmatprep.subr.bf16.mxu0 %v3740_v18 }
 0x177   :  { %2516 = vmatpush1.bf16.msra.mxu0 %v3738_v19 }
 0x178   :  { %2517 = vmatprep.subr.bf16.mxu0 %v3746_v20 }
 0x17b   :  { %2518 = vmatpush1.bf16.msra.mxu0 %v3744_v22 }
 0x17c   :  { %2519 = vmatprep.subr.bf16.mxu0 %v3752_v24 }
 0x17f   :  { %2520 = vmatpush1.bf16.msra.mxu0 %v3750_v25 }
 0x180   :  { %2521 = vmatprep.subr.bf16.mxu0 %v3758_v27 }
 0x183   :  { %2522 = vmatpush1.bf16.msra.mxu0 %v3756_v28 }
 0x184   :  { %2523 = vmatprep.subr.bf16.mxu0 %v3764_v29 }
 0x187   :  { %2524 = vmatpush1.bf16.msra.mxu0 %v3762_v30  ;;  %v3825_v30 = vld [vmem:[#allocation2 + $0x2e8] ss:$16 sps:$4 sm:$0xff]  }
 0x188   :  { %2525 = vmatprep.subr.bf16.mxu0 %v3770_v31 }
 0x18b   :  { %2526 = vmatpush1.bf16.msra.mxu0 %v3768_v32  ;;  %v3830_v32 = vld [vmem:[#allocation2 + $0x2cc] ss:$16 sps:$4 sm:$0xff]  }
 0x18c   :  { %2527 = vmatprep.subr.bf16.mxu0 %v3776_v33  ;;  %v3873_v33 = vld [vmem:[#allocation5 + $0x78] sm:$0xff]  }
 0x18f   :  { %2528 = vmatpush2.bf16.msra.mxu0 %v3774_v34  ;;  %v3874_v34 = vld [vmem:[#allocation5 + $0x38] sm:$0xff]  }
 0x190   :  { %2529 = vmatprep.subr.bf16.mxu0 %v3782_v35  ;;  %v3875_v35 = vld [vmem:[#allocation5 + $0x70] sm:$0xff]  }
 0x193   :  { %2530 = vmatpush2.bf16.msra.mxu0 %v3780_v36  ;;  %v3828_v36 = vld [vmem:[#allocation2 + $0x2c8] ss:$16 sps:$4 sm:$0xff]  }
 0x194   :  { %2531 = vmatprep.subr.bf16.mxu0 %v3788_v37  ;;  %v3876_v37 = vld [vmem:[#allocation5 + $0x30] sm:$0xff]  }
 0x197   :  { %2532 = vmatpush2.bf16.msra.mxu0 %v3786_v38  ;;  %v3877_v38 = vld [vmem:[#allocation5 + $0x68] sm:$0xff]  }
 0x198   :  { %2533 = vmatprep.subr.bf16.mxu0 %v3794_v39  ;;  %v3831_v39 = vld [vmem:[#allocation2 + $0x2a8] ss:$16 sps:$4 sm:$0xff]  }
 0x19b   :  { %2534 = vmatpush2.bf16.msra.mxu0 %v3792_v13  ;;  %v3836_v13 = vld [vmem:[#allocation2 + $0x28c] ss:$16 sps:$4 sm:$0xff]  }
 0x19c   :  { %2535 = vmatprep.subr.bf16.mxu0 %v3800_v42  ;;  %v3834_v42 = vld [vmem:[#allocation2 + $0x288] ss:$16 sps:$4 sm:$0xff]  }
 0x19e   :  { %v1528_v44 = vpop.f32.mrf.mxu0 }
 0x19f   :  { %2536 = vmatpush2.bf16.msra.mxu0 %v3798_v26  ;;  %v1529_v2 = vadd.f32 %v1528_v44, %v1486_v60  ;;  %v3839_v26 = vld [vmem:[#allocation2 + $0x26c] ss:$16 sps:$4 sm:$0xff]   ;;  %v3840_v44 = vld [vmem:[#allocation2 + $0x248] ss:$16 sps:$4 sm:$0xff]  }
 0x1a0   :  { %v1530_v49 = vpop.f32.mrf.mxu0  ;;  %2537 = vmatprep.subr.bf16.mxu0 %v3806_v43  ;;  %v3842_v43 = vld [vmem:[#allocation2 + $0x24c] ss:$16 sps:$4 sm:$0xff]  }
 0x1a1   :  { %v1531_v0 = vadd.f32 %v1530_v49, %v1488_v59  ;;  %v3848_v49 = vld [vmem:[#allocation2 + $0x20c] ss:$16 sps:$4 sm:$0xff]   ;;  %v3858_v59 = vld [vmem:[#allocation2 + $0x388] ss:$16 sps:$4 sm:$0xff]  }
 0x1a2   :  { %v1532_v53 = vpop.f32.mrf.mxu0  ;;  %v3863_v60 = vld [vmem:[#allocation2 + $0x36c] ss:$16 sps:$4 sm:$0xff]  }
 0x1a3   :  { %2538 = vmatpush2.bf16.msra.mxu0 %v3804_v47  ;;  %v1533_v5 = vadd.f32 %v1532_v53, %v1490_v63  ;;  %v3845_v47 = vld [vmem:[#allocation2 + $0x22c] ss:$16 sps:$4 sm:$0xff]   ;;  %v3864_v63 = vld [vmem:[#allocation2 + $0x348] ss:$16 sps:$4 sm:$0xff]  }
 0x1a4   :  { %v1534_v57 = vpop.f32.mrf.mxu0  ;;  %2539 = vmatprep.subr.bf16.mxu0 %v3812_v50  ;;  %v3846_v50 = vld [vmem:[#allocation2 + $0x208] ss:$16 sps:$4 sm:$0xff]   ;;  %v3854_v53 = vld [vmem:[#allocation2 + $0x3cc] ss:$16 sps:$4 sm:$0xff]  }
 0x1a5   :  { %v1535_v10 = vadd.f32 %v1534_v57, %v1492_v12  ;;  %v3855_v57 = vld [vmem:[#allocation2 + $0x3a8] ss:$16 sps:$4 sm:$0xff]   ;;  %v3880_v12 = vld [vmem:[#allocation5 + $0x20] sm:$0xff]  }
 0x1a6   :  { %v1614_v62 = vpop.f32.mrf.mxu0 }
 0x1a7   :  { %v1571_v61 = vpop.f32.mrf.mxu1  ;;  %2540 = vmatpush2.bf16.msra.mxu0 %v3810_v55  ;;  %v3852_v55 = vld [vmem:[#allocation2 + $0x3c8] ss:$16 sps:$4 sm:$0xff]  }
 0x1a8   :  { %v1616_v4 = vpop.f32.mrf.mxu0  ;;  %2541 = vmatprep.subr.bf16.mxu0 %v3818_v58  ;;  %v1572_v7 = vadd.f32 %v1571_v61, %v1529_v2  ;;  %v3860_v58 = vld [vmem:[#allocation2 + $0x38c] ss:$16 sps:$4 sm:$0xff]   ;;  %v3861_v61 = vld [vmem:[#allocation2 + $0x368] ss:$16 sps:$4 sm:$0xff]  }
 0x1a9   :  { %v1573_v3 = vpop.f32.mrf.mxu1  ;;  %v3872_v2 = vld [vmem:[#allocation2 + $0x30c] ss:$16 sps:$4 sm:$0xff]  }
 0x1aa   :  { %v1574_v6 = vadd.f32 %v1573_v3, %v1531_v0  ;;  %v1618_v9 = vpop.f32.mrf.mxu0  ;;  %v1615_v20 = vadd.f32 %v1614_v62, %v1572_v7  ;;  %v3866_v62 = vld [vmem:[#allocation2 + $0x34c] ss:$16 sps:$4 sm:$0xff]   ;;  %v3870_v3 = vld [vmem:[#allocation2 + $0x308] ss:$16 sps:$4 sm:$0xff]   ;;  %v3883_v7 = vld [vmem:[#allocation5 + $0x50] sm:$0xff]  }
 0x1ab   :  { %v1575_v8 = vpop.f32.mrf.mxu1  ;;  %2542 = vmatpush2.bf16.msra.mxu0 %v3816_v1  ;;  %v3869_v0 = vld [vmem:[#allocation2 + $0x32c] ss:$16 sps:$4 sm:$0xff]   ;;  %v3867_v1 = vld [vmem:[#allocation2 + $0x328] ss:$16 sps:$4 sm:$0xff]  }
 0x1ac   :  { %v1576_v11 = vadd.f32 %v1575_v8, %v1533_v5  ;;  %v1620_v16 = vpop.f32.mrf.mxu0  ;;  %v1617_v17 = vadd.f32 %v1616_v4, %v1574_v6  ;;  %v1625_v28 = vmax.f32 %v1615_v20, 0.0  ;;  %3333 = vmatprep.subr.bf16.mxu0 %v3873_v33  ;;  %v3879_v4 = vld [vmem:[#allocation5 + $0x60] sm:$0xff]   ;;  %v3881_v5 = vld [vmem:[#allocation5 + $0x58] sm:$0xff]   ;;  %v3884_v8 = vld [vmem:[#allocation5 + $0x10] sm:$0xff]  }
 0x1ad   :  { %v1577_v14 = vpop.f32.mrf.mxu1  ;;  %v3882_v6 = vld [vmem:[#allocation5 + $0x18] sm:$0xff]   ;;  %v3893_v20 = vld [vmem:[#allocation5 + $0xe8] sm:$0xff]   ;;  %v3903_v33 = vld [vmem:[#allocation5 + $0xc0] sm:$0xff]  }
 0x1ae   :  { %v1619_v18 = vadd.f32 %v1618_v9, %v1576_v11  ;;  %v1578_v19 = vadd.f32 %v1577_v14, %v1535_v10  ;;  %2544 = vmatmul.mubr.bf16.vlgmr.msra.gmra.mxu0 %v4704_v15  ;;  %v1626_v25 = vmax.f32 %v1617_v17, 0.0  ;;  %v3833_v15 = vld [vmem:[#allocation2 + $0x2ac] ss:$16 sps:$4 sm:$0xff]   ;;  %v3887_v11 = vld [vmem:[#allocation5 + $0x40] sm:$0xff]  }
 0x1af   :  { %3334 = vmatpush3.bf16.msra.mxu0 %v3874_v34  ;;  %v3885_v9 = vld [vmem:[#allocation5 + $0x48] sm:$0xff]   ;;  %v3888_v14 = vld [vmem:[#allocation5] sm:$0xff]   ;;  %v3890_v17 = vld [vmem:[#allocation5 + $0xb8] sm:$0xff]  }
 0x1b0   :  { %v1621_v22 = vadd.f32 %v1620_v16, %v1578_v19  ;;  %v1629_v24 = vmax.f32 %v1619_v18, 0.0  ;;  %3335 = vmatprep.subr.bf16.mxu0 %v3875_v35  ;;  %v3886_v10 = vld [vmem:[#allocation5 + $0x8] sm:$0xff]   ;;  %v3889_v16 = vld [vmem:[#allocation5 + $0xf8] sm:$0xff]   ;;  %v3891_v18 = vld [vmem:[#allocation5 + $0xf0] sm:$0xff]  }
 0x1b1   :  { %v3892_v19 = vld [vmem:[#allocation5 + $0xb0] sm:$0xff]   ;;  %v3904_v34 = vld [vmem:[#allocation5 + $0x80] sm:$0xff]  }
 0x1b2   :  { %v1630_v27 = vmax.f32 %v1621_v22, 0.0  ;;  %v4716_v31 = vpack.c.bf16 %v1629_v24, %v1625_v28  ;;  %v3894_v22 = vld [vmem:[#allocation5 + $0xa8] sm:$0xff]   ;;  %v3895_v24 = vld [vmem:[#allocation5 + $0xe0] sm:$0xff]   ;;  %v3898_v28 = vld [vmem:[#allocation5 + $0x98] sm:$0xff]  }
 0x1b3   :  { %3336 = vmatpush3.bf16.msra.mxu0 %v3876_v37 }
 0x1b4   :  { %v1634_v29 = vpack.c.bf16 %v1630_v27, %v1626_v25  ;;  %3337 = vmatprep.subr.bf16.mxu0 %v3877_v38  ;;  %v3896_v25 = vld [vmem:[#allocation5 + $0xa0] sm:$0xff]   ;;  %v3897_v27 = vld [vmem:[#allocation5 + $0xd8] sm:$0xff]  }
 0x1b6   :  { %2500 = vmatprep.mubr.bf16.mxu1 %v1634_v29 }
 0x1b7   :  { %2501 = vmatmul.mubr.bf16.vlgmr.msra.gmra.mxu1 %v4716_v31  ;;  %3338 = vmatpush3.bf16.msra.mxu0 %v3878_v40 }
 0x1b8   :  { %2555 = vmatpush1.bf16.msra.mxu1 %v3825_v30  ;;  %2586 = vmatprep.mubr.bf16.mxu1 %v1634_v29  ;;  %v3899_v29 = vld [vmem:[#allocation5 + $0xd0] sm:$0xff]  }
 0x1b9   :  { %2556 = vmatprep.subr.bf16.mxu1 %v3830_v32  ;;  %3339 = vmatprep.subr.bf16.mxu0 %v3879_v4  ;;  %v3900_v30 = vld [vmem:[#allocation5 + $0x90] sm:$0xff]   ;;  %v3902_v32 = vld [vmem:[#allocation5 + $0x88] sm:$0xff]  }
 0x1bb   :  { %3340 = vmatpush3.bf16.msra.mxu0 %v3880_v12 }
 0x1bc   :  { %2557 = vmatpush1.bf16.msra.mxu1 %v3828_v36  ;;  %3341 = vmatprep.subr.bf16.mxu0 %v3881_v5 }
 0x1bd   :  { %2558 = vmatprep.subr.bf16.mxu1 %v3833_v15  ;;  %v1763_v15 = vld [vmem:[%s4741_s4] sm:$0xf] }
 0x1be   :  { %v1772_v38 = vrot.slane %v1763_v15, %v281_v21 }
 0x1bf   :  { %3342 = vmatpush3.bf16.msra.mxu0 %v3882_v6 }
 0x1c0   :  { %2559 = vmatpush1.bf16.msra.mxu1 %v3831_v39  ;;  %3343 = vmatprep.subr.bf16.mxu0 %v3883_v7  ;;  %v1768_v39 = vrot.slane %v1763_v15, %v277_v41 }
 0x1c1   :  { %2560 = vmatprep.subr.bf16.mxu1 %v3836_v13 }
 0x1c3   :  { %3344 = vmatpush3.bf16.msra.mxu0 %v3884_v8 }
 0x1c4   :  { %2561 = vmatpush1.bf16.msra.mxu1 %v3834_v42  ;;  %3345 = vmatprep.subr.bf16.mxu0 %v3885_v9 }
 0x1c5   :  { %2562 = vmatprep.subr.bf16.mxu1 %v3839_v26 }
 0x1c7   :  { %3346 = vmatpush3.bf16.msra.mxu0 %v3886_v10 }
 0x1c8   :  { %2563 = vmatpush1.bf16.msra.mxu1 %v3837_v23  ;;  %3347 = vmatprep.subr.bf16.mxu0 %v3887_v11 }
 0x1c9   :  { %2564 = vmatprep.subr.bf16.mxu1 %v3842_v43 }
 0x1cb   :  { %3348 = vmatpush3.bf16.msra.mxu0 %v3888_v14 }
 0x1cc   :  { %2565 = vmatpush1.bf16.msra.mxu1 %v3840_v44 }
 0x1cd   :  { %2566 = vmatprep.subr.bf16.mxu1 %v3845_v47 }
 0x1d0   :  { %2567 = vmatpush1.bf16.msra.mxu1 %v3843_v48 }
 0x1d1   :  { %2568 = vmatprep.subr.bf16.mxu1 %v3848_v49 }
 0x1d4   :  { %2569 = vmatpush1.bf16.msra.mxu1 %v3846_v50 }
 0x1d5   :  { %2570 = vmatprep.subr.bf16.mxu1 %v3851_v51 }
 0x1d8   :  { %2571 = vmatpush2.bf16.msra.mxu1 %v3849_v52 }
 0x1d9   :  { %2572 = vmatprep.subr.bf16.mxu1 %v3854_v53 }
 0x1dc   :  { %2573 = vmatpush2.bf16.msra.mxu1 %v3852_v55 }
 0x1dd   :  { %2574 = vmatprep.subr.bf16.mxu1 %v3857_v56 }
 0x1e0   :  { %2575 = vmatpush2.bf16.msra.mxu1 %v3855_v57 }
 0x1e1   :  { %2576 = vmatprep.subr.bf16.mxu1 %v3860_v58 }
 0x1e4   :  { %2577 = vmatpush2.bf16.msra.mxu1 %v3858_v59 }
 0x1e5   :  { %2578 = vmatprep.subr.bf16.mxu1 %v3863_v60 }
 0x1e8   :  { %2579 = vmatpush2.bf16.msra.mxu1 %v3861_v61  ;;  %v1780_v61 = vrot.slane %v1763_v15, %v289_v45 }
 0x1e9   :  { %2580 = vmatprep.subr.bf16.mxu1 %v3866_v62  ;;  %v1776_v62 = vrot.slane %v1763_v15, %v285_v46 }
 0x1ec   :  { %2581 = vmatpush2.bf16.msra.mxu1 %v3864_v63 }
 0x1ed   :  { %2582 = vmatprep.subr.bf16.mxu1 %v3869_v0 }
 0x1f0   :  { %2583 = vmatpush2.bf16.msra.mxu1 %v3867_v1 }
 0x1f1   :  { %2584 = vmatprep.subr.bf16.mxu1 %v3872_v2 }
 0x1f4   :  { %2585 = vmatpush2.bf16.msra.mxu1 %v3870_v3 }
 0x1f5   :  { %3355 = vmatprep.subr.bf16.mxu1 %v3889_v16 }
 0x1f7   :  { %2587 = vmatmul.mubr.bf16.vlgmr.msra.gmra.mxu1 %v4716_v31  ;;  %v3901_v31 = vld [vmem:[#allocation5 + $0xc8] sm:$0xff]  }
 0x1f8   :  { %3356 = vmatpush3.bf16.msra.mxu1 %v3890_v17 }
 0x1f9   :  { %3357 = vmatprep.subr.bf16.mxu1 %v3891_v18 }
 0x1fc   :  { %3358 = vmatpush3.bf16.msra.mxu1 %v3892_v19 }
 0x1fd   :  { %3359 = vmatprep.subr.bf16.mxu1 %v3893_v20 }
 0x200   :  { %3360 = vmatpush3.bf16.msra.mxu1 %v3894_v22  ;;  %v3300_v22 = vld [vmem:[%s4743_s6] ss:$0 sm:$0xff] }
 0x201   :  { %3361 = vmatprep.subr.bf16.mxu1 %v3895_v24 }
 0x204   :  { %3362 = vmatpush3.bf16.msra.mxu1 %v3896_v25 }
 0x205   :  { %3363 = vmatprep.subr.bf16.mxu1 %v3897_v27 }
 0x208   :  { %3364 = vmatpush3.bf16.msra.mxu1 %v3898_v28 }
 0x209   :  { %3365 = vmatprep.subr.bf16.mxu1 %v3899_v29 }
 0x20c   :  { %3366 = vmatpush3.bf16.msra.mxu1 %v3900_v30 }
 0x20d   :  { %3367 = vmatprep.subr.bf16.mxu1 %v3901_v31 }
 0x210   :  { %3368 = vmatpush3.bf16.msra.mxu1 %v3902_v32 }
 0x211   :  { %3369 = vmatprep.subr.bf16.mxu1 %v3903_v33 }
 0x214   :  { %3370 = vmatpush3.bf16.msra.mxu1 %v3904_v34 }
 0x22e   :  { %v2459_v35 = vpop.f32.mrf.mxu0 }
 0x22f   :  { %v2460_v43 = vadd.f32 %v2459_v35, %v1768_v39 }
 0x230   :  { %v2461_v36 = vpop.f32.mrf.mxu0 }
 0x231   :  { %v2462_v26 = vadd.f32 %v2461_v36, %v1772_v38 }
 0x232   :  { %v2463_v37 = vpop.f32.mrf.mxu0 }
 0x233   :  { %v2464_v23 = vadd.f32 %v2463_v37, %v1768_v39 }
 0x234   :  { %v2465_v40 = vpop.f32.mrf.mxu0 }
 0x235   :  { %v2466_v47 = vadd.f32 %v2465_v40, %v1772_v38 }
 0x26e   :  { %v2545_v41 = vpop.f32.mrf.mxu0 }
 0x26f   :  { %v2546_v4 = vadd.f32 %v2545_v41, %v1776_v62 }
 0x270   :  { %v2547_v59 = vpop.f32.mrf.mxu0 }
 0x271   :  { %v2548_v2 = vadd.f32 %v2547_v59, %v1780_v61 }
 0x272   :  { %v2549_v60 = vpop.f32.mrf.mxu0 }
 0x273   :  { %v2550_v3 = vadd.f32 %v2549_v60, %v1776_v62 }
 0x274   :  { %v2551_v0 = vpop.f32.mrf.mxu0 }
 0x275   :  { %v2552_v5 = vadd.f32 %v2551_v0, %v1780_v61 }
 0x277   :  { %v2502_v13 = vpop.f32.mrf.mxu1 }
 0x278   :  { %v2503_v50 = vadd.f32 %v2502_v13, %v2460_v43 }
 0x279   :  { %v2504_v42 = vpop.f32.mrf.mxu1 }
 0x27a   :  { %v2505_v48 = vadd.f32 %v2504_v42, %v2462_v26  ;;  %v2597_v21 = vmax.f32 %v2503_v50, 0.0 }
 0x27b   :  { %v2506_v44 = vpop.f32.mrf.mxu1 }
 0x27c   :  { %v2507_v49 = vadd.f32 %v2506_v44, %v2464_v23  ;;  %v2598_v55 = vmax.f32 %v2505_v48, 0.0 }
 0x27d   :  { %v2508_v51 = vpop.f32.mrf.mxu1 }
 0x27e   :  { %v2509_v52 = vadd.f32 %v2508_v51, %v2466_v47  ;;  %v2601_v53 = vmax.f32 %v2507_v49, 0.0 }
 0x280   :  { %v2602_v56 = vmax.f32 %v2509_v52, 0.0  ;;  %v2605_v58 = vpack.c.bf16 %v2601_v53, %v2597_v21 }
 0x282   :  { %v2606_v57 = vpack.c.bf16 %v2602_v56, %v2598_v55 }
 0x284   :  { %2904 = vmatprep.mubr.bf16.mxu0 %v2606_v57 }
 0x285   :  { %2905 = vmatmul.mubr.bf16.vlgmr.msra.gmra.mxu0 %v2605_v58 }
 0x2b7   :  { %v2588_v63 = vpop.f32.mrf.mxu1 }
 0x2b8   :  { %v2589_v8 = vadd.f32 %v2588_v63, %v2546_v4 }
 0x2b9   :  { %v2590_v1 = vpop.f32.mrf.mxu1 }
 0x2ba   :  { %v2591_v6 = vadd.f32 %v2590_v1, %v2548_v2  ;;  %v2599_v45 = vmax.f32 %v2589_v8, 0.0 }
 0x2bb   :  { %v2592_v12 = vpop.f32.mrf.mxu1 }
 0x2bc   :  { %v2593_v7 = vadd.f32 %v2592_v12, %v2550_v3  ;;  %v2600_v14 = vmax.f32 %v2591_v6, 0.0 }
 0x2bd   :  { %v2594_v9 = vpop.f32.mrf.mxu1 }
 0x2be   :  { %v2595_v10 = vadd.f32 %v2594_v9, %v2552_v5  ;;  %v2603_v11 = vmax.f32 %v2593_v7, 0.0 }
 0x2c0   :  { %v2604_v16 = vmax.f32 %v2595_v10, 0.0  ;;  %v2607_v54 = vpack.c.bf16 %v2603_v11, %v2599_v45 }
 0x2c2   :  { %v2608_v17 = vpack.c.bf16 %v2604_v16, %v2600_v14 }
 0x2c4   :  { %2945 = vmatprep.mubr.bf16.mxu1 %v2608_v17 }
 0x2c5   :  { %2946 = vmatmul.mubr.bf16.vlgmr.msra.gmra.mxu1 %v2607_v54 }
 0x345   :  { %v3349_v46 = vpop.f32.mrf.mxu0 }
 0x347   :  { %v3350_v18 = vpop.f32.mrf.mxu0 }
 0x348   :  { %v3351_v20 = vadd.f32 %v3350_v18, %v3349_v46 }
 0x349   :  { %v3352_v19 = vpop.f32.mrf.mxu0 }
 0x34a   :  { %v2907_v28 = vadd.f32 %v3351_v20, %v3300_v22 }
 0x34b   :  { %v3353_v24 = vpop.f32.mrf.mxu0 }
 0x34c   :  { %v3354_v29 = vadd.f32 %v3353_v24, %v3352_v19 }
 0x34e   :  { %v2910_v34 = vadd.f32 %v3354_v29, %v3300_v22 }
 0x385   :  { %v3371_v25 = vpop.f32.mrf.mxu1 }
 0x387   :  { %v3372_v27 = vpop.f32.mrf.mxu1 }
 0x388   :  { %v3373_v30 = vadd.f32 %v3372_v27, %v3371_v25 }
 0x389   :  { %v3374_v31 = vpop.f32.mrf.mxu1 }
 0x38a   :  { %v2948_v32 = vadd.f32 %v3373_v30, %v2907_v28 }
 0x38b   :  { %v3375_v33 = vpop.f32.mrf.mxu1 }
 0x38c   :  { %2954 = vst [vmem:[#allocation7] sm:$0xff] %v2948_v32  ;;  %v3376_v35 = vadd.f32 %v3375_v33, %v3374_v31 }
 0x38e   :  { %v2951_v36 = vadd.f32 %v3376_v35, %v2910_v34 }
 0x390   :  { %2955 = vst [vmem:[#allocation7 + $0x8] sm:$0xff] %v2951_v36 }
 0x391   :  { %3956 = shalt.err (!%p3953_p0)
}
 0x392   :  { %s3979_s6 = smov 128   ;;  %s3980_s10 = smov 8  }
 0x393   :  { %2967 = dma.vmem_to_hbm [thread:$0]  %s2962_s8, 256, %s4744_s7, [#allocation4], %s3979_s6, %s3979_s6, %s3980_s10  }
 0x394   :  { %3969 = dma.done.wait [#allocation4], 256  }
 0x395   :  { %3970 = vsyncadd [#allocation4], 4294967040 }
 0x396   :  { %2971 = vsyncpa [#allocation3], 1 }
 0x397   :  { %2972 = vsyncpa [#allocation6], 1 }
 0x398   :  { %2973 = vsyncpa [#allocation4], 1 }

</bundles_post_ra>
